<compile_context>
chip_gen: v7x
topology: tpu7x:2x2x1
jax: 0.10.0
libtpu: 0.0.40
codegen_flags: <defaults>
</compile_context>

<pallas_src>
import numpy as np
import jax
import jax.numpy as jnp
from jax import lax
from jax.experimental import pallas as pl
from jax.experimental.pallas import tpu as pltpu

# ----------------------------- configuration (args) -----------------------------
B, ND, LQ, LD = 2, 2, 8, 16          # batch, docs per query, query terms, doc terms
H = 32                                # num_hidden_nodes
V = 64                                # vocab_size
K_RBF = 8                             # rbf_kernel_dim
POOL, STRIDE = 4, 2                   # rbf_kernel_pool_size / stride
LP = (LD - POOL) // STRIDE + 1        # pooled length (= 7)
NHEADS = 4                            # num_attn_heads
NLAYERS = 1                           # num_encoder_layers
F = B * ND                            # flattened (batch, doc) pairs
NQ = F * LQ                           # rows: (batch*doc, query term)      = 32
NDJ = F * LD                          # doc-term rows: (batch*doc, term)   = 64
KL = K_RBF * NDJ                      # lane-packed (rbf bin, doc, term)   = 512
KP = K_RBF * LP                       # lane-packed (rbf bin, pooled pos)  = 56
PH = LP * H                           # lane-packed (pooled pos, hidden)   = 224

MUS = np.array([1.0 - 2.0 * i / K_RBF for i in range(K_RBF)], np.float32)  # RBF mus
INV_DENOM = float(1.0 / (2.0 * 0.1 ** 2))                                  # 1/(2*sigma^2)

# --------------------- static structural matrices (numpy, 0/1) -------------------
_pool_np = np.zeros((LD, LP), np.float32)
for _p in range(LP):
    _pool_np[STRIDE * _p:STRIDE * _p + POOL, _p] = 1.0                     # AvgPool window

# replication: lane-pack K copies of the (doc,term) similarity row.
REP_NP = np.tile(np.eye(NDJ, dtype=np.float32), (1, K_RBF))                # (NDJ, KL)
# per-lane mu value (mu_k repeated over the NDJ doc-term lanes of bin k).
MU_NP = np.repeat(MUS, NDJ)[None, :].astype(np.float32)                    # (1, KL)
# block-diagonal pooling: sums the POOL-wide window of the matching bin / doc.
POOLBIG_NP = np.kron(np.eye(K_RBF, dtype=np.float32),
                     np.tile(_pool_np, (F, 1))).astype(np.float32)         # (KL, KP)
# selection matrix for the final per-doc sum over query terms.
SEL_NP = np.kron(np.eye(F, dtype=np.float32),
                 np.ones((1, LQ), np.float32)).astype(np.float32)          # (F, NQ)


# ----------------------------------- Pallas kernel -------------------------------
def ndrm3_kernel(q_ref, d_ref, rep_ref, mu_ref, maskk_ref, pool_ref,
                 w1_ref, b1_ref, w2_ref, sel_ref,
                 maskq_ref, qidf_ref, tf_ref, dlen_ref,
                 cw_ref, cb_ref, b2_ref, out_ref):
    # ---- NDRM1: cosine similarity (each norm clamped at 1e-8, as in torch) ----
    q = q_ref[...]                                       # (NQ, H)
    d = d_ref[...]                                       # (NDJ, H)
    qn = jnp.sqrt(jnp.sum(q * q, axis=1, keepdims=True))
    dn = jnp.sqrt(jnp.sum(d * d, axis=1, keepdims=True))
    q_hat = q / jnp.maximum(qn, 1e-8)
    d_hat = d / jnp.maximum(dn, 1e-8)
    cross = lax.dot_general(q_hat, d_hat, (((1,), (1,)), ((), ())),
                            preferred_element_type=jnp.float32)            # (NQ, NDJ)

    # ---- RBFKernel: lane-pack the K bins (one matmul), one exp, one pooled matmul ----
    simk = jnp.dot(cross, rep_ref[...], preferred_element_type=jnp.float32)  # (NQ, KL)
    y = jnp.exp(-((simk - mu_ref[...]) ** 2) * INV_DENOM) * maskk_ref[...]   # (NQ, KL)
    pk = jnp.dot(y, pool_ref[...], preferred_element_type=jnp.float32)       # (NQ, KP)
    z = jnp.log(pk + 1e-6)                                                   # (NQ, KP)

    # ---- RBF fc: Linear(K,H) -> ReLU -> (Dropout=id) -> Linear(H,1), max over LP ----
    h = jnp.maximum(
        jnp.dot(z, w1_ref[...], preferred_element_type=jnp.float32) + b1_ref[...],
        0.0)                                                                 # (NQ, PH)
    s = jnp.dot(h, w2_ref[...], preferred_element_type=jnp.float32) + b2_ref[0]  # (NQ, LP)
    mask_q = maskq_ref[...]                                                  # (NQ, 1)
    y_lat = jnp.max(s, axis=1, keepdims=True) * mask_q                       # (NQ, 1)

    # ---- NDRM2 (BatchScale with fresh running_mean = 0 -> divide by 1e-6) ----
    tf = tf_ref[...] * 1e6                                                   # norm_tf
    dlen_n = jnp.maximum(dlen_ref[...] * 1e6, 0.0)                           # ReLU(1*x+0)
    y_exp = tf / (tf + dlen_n + 1e-6) * qidf_ref[...] * mask_q               # (NQ, 1)

    # ---- NDRM3 head (eval BatchNorm folded into cw/cb) + per-doc sum over q terms ----
    y_comb = (y_lat * cw_ref[0] + y_exp * cw_ref[1] + cb_ref[0]) * mask_q    # (NQ, 1)
    out_ref[...] = jnp.dot(sel_ref[...], y_comb,
                           preferred_element_type=jnp.float32)               # (F, 1)


def ndrm3_pallas(q_fc, d_comb, mask_d, mask_q, q_idf, qd,
                 w1, b1, w2, b2, cw, cb, dlen):
    # -------- layout plumbing (tiny, done once per call in the wrapper) --------
    q2 = jnp.repeat(q_fc, ND, axis=0).reshape(NQ, H)             # q broadcast over docs
    d2 = d_comb.reshape(NDJ, H)

    mask_flat = mask_d.reshape(F, LD)
    # mask for the lane-packed sim: zero off-diagonal doc blocks and padded terms.
    m_f = (jnp.eye(F, dtype=jnp.float32)[:, :, None] *
           mask_flat[None, :, :]).reshape(F, NDJ)                # (F, NDJ)
    maskk = jnp.repeat(jnp.tile(m_f, (1, K_RBF)), LQ, axis=0)    # (NQ, KL)

    maskq_col = jnp.repeat(mask_q, ND, axis=0).reshape(NQ, 1)
    qidf_col = jnp.repeat(q_idf, ND, axis=0).reshape(NQ, 1)
    tf_col = qd.reshape(NQ, 1)
    dlen_col = jnp.repeat(dlen.reshape(F), LQ).reshape(NQ, 1)

    # block-diagonal (over pooled positions) RBF-fc weights -> pure MXU matmuls.
    eye_lp = jnp.eye(LP, dtype=jnp.float32)
    w1_big = (w1.T[:, None, None, :] * eye_lp[None, :, :, None]).reshape(KP, PH)
    b1_big = jnp.tile(b1, (LP,)).reshape(1, PH)
    w2_big = (eye_lp[:, None, :] * w2[None, :, None]).reshape(PH, LP)

    vmem = pl.BlockSpec(memory_space=pltpu.MemorySpace.VMEM)
    smem = pl.BlockSpec(memory_space=pltpu.MemorySpace.SMEM)
    out = pl.pallas_call(
        ndrm3_kernel,
        out_shape=jax.ShapeDtypeStruct((F, 1), jnp.float32),
        in_specs=[vmem] * 14 + [smem] * 3,
        out_specs=pl.BlockSpec(memory_space=pltpu.MemorySpace.VMEM),
    )(q2, d2, jnp.asarray(REP_NP), jnp.asarray(MU_NP), maskk, jnp.asarray(POOLBIG_NP),
      w1_big, b1_big, w2_big, jnp.asarray(SEL_NP),
      maskq_col, qidf_col, tf_col, dlen_col,
      cw, cb, b2)
    return out.reshape(B, ND)


# ------------------------------ plain-JAX glue (upstream) ------------------------
def sinusoidal_pe(max_len, d):
    pos = np.arange(max_len)[:, None].astype(np.float32)
    div = np.exp(np.arange(0, d, 2).astype(np.float32) * (-np.log(10000.0) / d))
    pe = np.zeros((max_len, d), np.float32)
    pe[:, 0::2] = np.sin(pos * div)
    pe[:, 1::2] = np.cos(pos * div)
    return jnp.asarray(pe)


def layer_norm(x, g, b, eps=1e-5):
    mu = x.mean(axis=-1, keepdims=True)
    var = ((x - mu) ** 2).mean(axis=-1, keepdims=True)
    return (x - mu) / jnp.sqrt(var + eps) * g + b


def encoder_layer(x, mask_valid, p):
    # x: (S, N, H) seq-first; mask_valid: (N, S) 1.0 = valid token.
    S, N, Hd = x.shape
    dh = Hd // NHEADS
    q = x @ p["wq"].T + p["bq"]
    k = x @ p["wk"].T + p["bk"]
    v = x @ p["wv"].T + p["bv"]

    def split(t):
        return t.transpose(1, 0, 2).reshape(N, S, NHEADS, dh).transpose(0, 2, 1, 3)

    qh, kh, vh = split(q), split(k), split(v)
    logits = jnp.einsum("nhqd,nhkd->nhqk", qh, kh) / jnp.sqrt(jnp.float32(dh))
    logits = logits + jnp.where(mask_valid[:, None, None, :] > 0, 0.0, -1e9)
    attn = jax.nn.softmax(logits, axis=-1)
    ctx = jnp.einsum("nhqk,nhkd->nhqd", attn, vh)
    ctx = ctx.transpose(2, 0, 1, 3).reshape(S, N, Hd)
    ctx = ctx @ p["wo"].T + p["bo"]
    x = layer_norm(x + ctx, p["ln1_g"], p["ln1_b"])
    ff = jnp.maximum(x @ p["w1"].T + p["b1"], 0.0) @ p["w2"].T + p["b2"]
    x = layer_norm(x + ff, p["ln2_g"], p["ln2_b"])
    return x


def ndrm3_forward(params, q_ids, d_ids, qd, mask_q, mask_d, q_idf, dlen):
    E = params["embed"]
    q = E[q_ids]                               # (B, LQ, H)
    q = q @ params["wqt"].T + params["bqt"]    # fc_qt
    d = E[d_ids]                               # (B, ND, LD, H)

    mask_flat = mask_d.reshape(F, LD)
    x = d.reshape(F, LD, H).transpose(1, 0, 2)            # (LD, F, H) seq-first
    x = x + params["pe"][:LD][:, None, :]                 # PositionalEncoding (dropout=id)
    # TODO(synk): ConformerEncoderLayer / ConformerEncoder / PositionalEncoding sources
    # are not provided in the reference; approximated with sinusoidal PE + a standard
    # post-LN transformer encoder layer with key-padding masking.
    for layer in params["enc_layers"]:
        x = encoder_layer(x, mask_flat, layer)
    d_ctx = x.transpose(1, 0, 2).reshape(B, ND, LD, H)

    wc, bc = params["w_ctx"], params["b_ctx"]             # fc_ctx: Linear(2, 1)
    d_comb = d * wc[0, 0] + d_ctx * wc[0, 1] + bc[0]      # applied to stack([d, d_ctx], -1)

    # Fold BatchNorm1d(2) (eval: running mean/var + affine) into the final Linear(2, 1).
    eps_bn = 1e-5
    eff_scale = params["bn_g"] / jnp.sqrt(params["bn_var"] + eps_bn)
    eff_shift = params["bn_b"] - params["bn_mean"] * eff_scale
    cw = params["w_fc"][0] * eff_scale                    # (2,)
    cb = params["b_fc"] + jnp.sum(params["w_fc"][0] * eff_shift, keepdims=True)  # (1,)

    return ndrm3_pallas(q, d_comb, mask_d, mask_q, q_idf, qd,
                        params["w_rbf1"], params["b_rbf1"],
                        params["w_rbf2"], params["b_rbf2"], cw, cb, dlen)


# --------------------------------- parameter init --------------------------------
def init_params(key):
    ks = iter(jax.random.split(key, 64))

    def nrm(shape, scale=0.1):
        return scale * jax.random.normal(next(ks), shape, dtype=jnp.float32)

    enc_layers = []
    for _ in range(NLAYERS):
        enc_layers.append(dict(
            wq=nrm((H, H)), bq=nrm((H,), 0.01),
            wk=nrm((H, H)), bk=nrm((H,), 0.01),
            wv=nrm((H, H)), bv=nrm((H,), 0.01),
            wo=nrm((H, H)), bo=nrm((H,), 0.01),
            w1=nrm((H, H)), b1=nrm((H,), 0.01),
            w2=nrm((H, H)), b2=nrm((H,), 0.01),
            ln1_g=jnp.ones((H,), jnp.float32), ln1_b=jnp.zeros((H,), jnp.float32),
            ln2_g=jnp.ones((H,), jnp.float32), ln2_b=jnp.zeros((H,), jnp.float32),
        ))

    return dict(
        embed=nrm((V, H), 0.5),                            # pretrained_embeddings
        wqt=nrm((H, H)), bqt=nrm((H,), 0.01),              # fc_qt
        enc_layers=enc_layers,
        pe=sinusoidal_pe(LD, H),
        w_ctx=nrm((1, 2), 0.5), b_ctx=nrm((1,), 0.01),     # fc_ctx
        w_rbf1=nrm((H, K_RBF), 0.3), b_rbf1=nrm((H,), 0.01),   # RBF fc Linear(K, H)
        w_rbf2=nrm((H,), 0.3), b_rbf2=nrm((1,), 0.01),         # RBF fc Linear(H, 1)
        w_fc=nrm((1, 2), 0.5), b_fc=nrm((1,), 0.01),           # NDRM3 Linear(2, 1)
        bn_g=jnp.ones((2,), jnp.float32), bn_b=jnp.zeros((2,), jnp.float32),
        bn_mean=jnp.zeros((2,), jnp.float32), bn_var=jnp.ones((2,), jnp.float32),
    )


# -------------------------------------- main --------------------------------------
if __name__ == "__main__":
    key = jax.random.PRNGKey(0)
    kp, kq, kd, kqd, kidf, klen = jax.random.split(key, 6)
    params = init_params(kp)

    q_ids = jax.random.randint(kq, (B, LQ), 0, V)
    d_ids = jax.random.randint(kd, (B, ND, LD), 0, V)
    mask_q = jnp.concatenate(
        [jnp.ones((B, LQ - 2)), jnp.zeros((B, 2))], axis=1).astype(jnp.float32)
    mask_d = jnp.concatenate(
        [jnp.ones((B, ND, LD - 4)), jnp.zeros((B, ND, 4))], axis=2).astype(jnp.float32)
    qd = jax.random.uniform(kqd, (B, ND, LQ), jnp.float32, 0.0, 5.0)
    q_idf = jax.random.uniform(kidf, (B, LQ), jnp.float32, 0.5, 3.0)
    dlen = jax.random.uniform(klen, (B, ND), jnp.float32, 10.0, 100.0)

    y = jax.jit(ndrm3_forward)(params, q_ids, d_ids, qd, mask_q, mask_d, q_idf, dlen)
    y = jax.block_until_ready(y)
    assert y.shape == (B, ND), y.shape
    assert bool(jnp.all(jnp.isfinite(y)))
    print("KERNEL_OK")
</pallas_src>

<mosaic_0001>
module attributes {stable_mosaic.version = 11 : i64} {
  func.func @ndrm3_kernel(%arg0: memref<32x32xf32, #tpu.memory_space<vmem>>, %arg1: memref<64x32xf32, #tpu.memory_space<vmem>>, %arg2: memref<64x512xf32, #tpu.memory_space<vmem>>, %arg3: memref<1x512xf32, #tpu.memory_space<vmem>>, %arg4: memref<32x512xf32, #tpu.memory_space<vmem>>, %arg5: memref<512x56xf32, #tpu.memory_space<vmem>>, %arg6: memref<56x224xf32, #tpu.memory_space<vmem>>, %arg7: memref<1x224xf32, #tpu.memory_space<vmem>>, %arg8: memref<224x7xf32, #tpu.memory_space<vmem>>, %arg9: memref<4x32xf32, #tpu.memory_space<vmem>>, %arg10: memref<32x1xf32, #tpu.memory_space<vmem>>, %arg11: memref<32x1xf32, #tpu.memory_space<vmem>>, %arg12: memref<32x1xf32, #tpu.memory_space<vmem>>, %arg13: memref<32x1xf32, #tpu.memory_space<vmem>>, %arg14: memref<2xf32, #tpu.memory_space<smem>>, %arg15: memref<1xf32, #tpu.memory_space<smem>>, %arg16: memref<1xf32, #tpu.memory_space<smem>>, %arg17: memref<4x1xf32, #tpu.memory_space<vmem>>) attributes {dimension_semantics = [], scalar_prefetch = 0 : i64, scratch_operands = 0 : i64, tpu.core_type = #tpu.core_type<tc>} {
    %c0 = arith.constant 0 : index
    %c0_0 = arith.constant 0 : index
    %0 = vector.load %arg0[%c0, %c0_0] : memref<32x32xf32, #tpu.memory_space<vmem>>, vector<32x32xf32>
    %c0_1 = arith.constant 0 : index
    %c0_2 = arith.constant 0 : index
    %1 = vector.load %arg1[%c0_1, %c0_2] : memref<64x32xf32, #tpu.memory_space<vmem>>, vector<64x32xf32>
    %2 = arith.mulf %0, %0 : vector<32x32xf32>
    %cst = arith.constant dense<0.000000e+00> : vector<32xf32>
    %3 = vector.multi_reduction <add>, %2, %cst [1] : vector<32x32xf32> to vector<32xf32>
    %4 = vector.shape_cast %3 : vector<32xf32> to vector<32x1xf32>
    %5 = math.sqrt %4 : vector<32x1xf32>
    %6 = arith.mulf %1, %1 : vector<64x32xf32>
    %cst_3 = arith.constant dense<0.000000e+00> : vector<64xf32>
    %7 = vector.multi_reduction <add>, %6, %cst_3 [1] : vector<64x32xf32> to vector<64xf32>
    %8 = vector.shape_cast %7 : vector<64xf32> to vector<64x1xf32>
    %9 = math.sqrt %8 : vector<64x1xf32>
    %cst_4 = arith.constant 9.99999993E-9 : f32
    %10 = vector.broadcast %cst_4 : f32 to vector<32x1xf32>
    %11 = arith.maximumf %5, %10 : vector<32x1xf32>
    %12 = vector.broadcast %11 : vector<32x1xf32> to vector<32x32xf32>
    %13 = arith.divf %0, %12 : vector<32x32xf32>
    %cst_5 = arith.constant 9.99999993E-9 : f32
    %14 = vector.broadcast %cst_5 : f32 to vector<64x1xf32>
    %15 = arith.maximumf %9, %14 : vector<64x1xf32>
    %16 = vector.broadcast %15 : vector<64x1xf32> to vector<64x32xf32>
    %17 = arith.divf %1, %16 : vector<64x32xf32>
    %cst_6 = arith.constant dense<0.000000e+00> : vector<32x64xf32>
    %18 = tpu.matmul %13, %17, %cst_6 {dimension_numbers = #tpu.dot_dimension_numbers<[1], [1], [0], [0], [0, 0, 1, 0], [], []>} : vector<32x32xf32>, vector<64x32xf32>, vector<32x64xf32> -> vector<32x64xf32>
    %c0_7 = arith.constant 0 : index
    %c0_8 = arith.constant 0 : index
    %19 = vector.load %arg2[%c0_7, %c0_8] : memref<64x512xf32, #tpu.memory_space<vmem>>, vector<64x512xf32>
    %cst_9 = arith.constant dense<0.000000e+00> : vector<32x512xf32>
    %20 = tpu.matmul %18, %19, %cst_9 {dimension_numbers = #tpu.dot_dimension_numbers<[1], [0], [0], [1], [0, 0, 1, 1], [], []>} : vector<32x64xf32>, vector<64x512xf32>, vector<32x512xf32> -> vector<32x512xf32>
    %c0_10 = arith.constant 0 : index
    %c0_11 = arith.constant 0 : index
    %21 = vector.load %arg3[%c0_10, %c0_11] : memref<1x512xf32, #tpu.memory_space<vmem>>, vector<1x512xf32>
    %22 = vector.broadcast %21 : vector<1x512xf32> to vector<32x512xf32>
    %23 = arith.subf %20, %22 : vector<32x512xf32>
    %24 = arith.mulf %23, %23 : vector<32x512xf32>
    %cst_12 = arith.constant 0.000000e+00 : f32
    %25 = vector.broadcast %cst_12 : f32 to vector<32x512xf32>
    %26 = arith.subf %25, %24 : vector<32x512xf32>
    %cst_13 = arith.constant 5.000000e+01 : f32
    %27 = vector.broadcast %cst_13 : f32 to vector<32x512xf32>
    %28 = arith.mulf %26, %27 : vector<32x512xf32>
    %29 = math.exp %28 : vector<32x512xf32>
    %c0_14 = arith.constant 0 : index
    %c0_15 = arith.constant 0 : index
    %30 = vector.load %arg4[%c0_14, %c0_15] : memref<32x512xf32, #tpu.memory_space<vmem>>, vector<32x512xf32>
    %31 = arith.mulf %29, %30 : vector<32x512xf32>
    %c0_16 = arith.constant 0 : index
    %c0_17 = arith.constant 0 : index
    %32 = vector.load %arg5[%c0_16, %c0_17] : memref<512x56xf32, #tpu.memory_space<vmem>>, vector<512x56xf32>
    %cst_18 = arith.constant dense<0.000000e+00> : vector<32x56xf32>
    %33 = tpu.matmul %31, %32, %cst_18 {dimension_numbers = #tpu.dot_dimension_numbers<[1], [0], [0], [1], [0, 0, 1, 1], [], []>} : vector<32x512xf32>, vector<512x56xf32>, vector<32x56xf32> -> vector<32x56xf32>
    %cst_19 = arith.constant 9.99999997E-7 : f32
    %34 = vector.broadcast %cst_19 : f32 to vector<32x56xf32>
    %35 = arith.addf %33, %34 : vector<32x56xf32>
    %36 = math.log %35 : vector<32x56xf32>
    %c0_20 = arith.constant 0 : index
    %c0_21 = arith.constant 0 : index
    %37 = vector.load %arg6[%c0_20, %c0_21] : memref<56x224xf32, #tpu.memory_space<vmem>>, vector<56x224xf32>
    %cst_22 = arith.constant dense<0.000000e+00> : vector<32x224xf32>
    %38 = tpu.matmul %36, %37, %cst_22 {dimension_numbers = #tpu.dot_dimension_numbers<[1], [0], [0], [1], [0, 0, 1, 1], [], []>} : vector<32x56xf32>, vector<56x224xf32>, vector<32x224xf32> -> vector<32x224xf32>
    %c0_23 = arith.constant 0 : index
    %c0_24 = arith.constant 0 : index
    %39 = vector.load %arg7[%c0_23, %c0_24] : memref<1x224xf32, #tpu.memory_space<vmem>>, vector<1x224xf32>
    %40 = vector.broadcast %39 : vector<1x224xf32> to vector<32x224xf32>
    %41 = arith.addf %38, %40 : vector<32x224xf32>
    %cst_25 = arith.constant 0.000000e+00 : f32
    %42 = vector.broadcast %cst_25 : f32 to vector<32x224xf32>
    %43 = arith.maximumf %41, %42 : vector<32x224xf32>
    %c0_26 = arith.constant 0 : index
    %c0_27 = arith.constant 0 : index
    %44 = vector.load %arg8[%c0_26, %c0_27] : memref<224x7xf32, #tpu.memory_space<vmem>>, vector<224x7xf32>
    %cst_28 = arith.constant dense<0.000000e+00> : vector<32x7xf32>
    %45 = tpu.matmul %43, %44, %cst_28 {dimension_numbers = #tpu.dot_dimension_numbers<[1], [0], [0], [1], [0, 0, 1, 1], [], []>} : vector<32x224xf32>, vector<224x7xf32>, vector<32x7xf32> -> vector<32x7xf32>
    %c0_29 = arith.constant 0 : index
    %46 = memref.load %arg16[%c0_29] : memref<1xf32, #tpu.memory_space<smem>>
    %47 = vector.broadcast %46 : f32 to vector<32x7xf32>
    %48 = arith.addf %45, %47 : vector<32x7xf32>
    %c0_30 = arith.constant 0 : index
    %c0_31 = arith.constant 0 : index
    %49 = vector.load %arg10[%c0_30, %c0_31] : memref<32x1xf32, #tpu.memory_space<vmem>>, vector<32x1xf32>
    %cst_32 = arith.constant dense<0xFF800000> : vector<32xf32>
    %50 = vector.multi_reduction <maximumf>, %48, %cst_32 [1] : vector<32x7xf32> to vector<32xf32>
    %51 = vector.shape_cast %50 : vector<32xf32> to vector<32x1xf32>
    %52 = arith.mulf %51, %49 : vector<32x1xf32>
    %c0_33 = arith.constant 0 : index
    %c0_34 = arith.constant 0 : index
    %53 = vector.load %arg12[%c0_33, %c0_34] : memref<32x1xf32, #tpu.memory_space<vmem>>, vector<32x1xf32>
    %cst_35 = arith.constant 1.000000e+06 : f32
    %54 = vector.broadcast %cst_35 : f32 to vector<32x1xf32>
    %55 = arith.mulf %53, %54 : vector<32x1xf32>
    %c0_36 = arith.constant 0 : index
    %c0_37 = arith.constant 0 : index
    %56 = vector.load %arg13[%c0_36, %c0_37] : memref<32x1xf32, #tpu.memory_space<vmem>>, vector<32x1xf32>
    %cst_38 = arith.constant 1.000000e+06 : f32
    %57 = vector.broadcast %cst_38 : f32 to vector<32x1xf32>
    %58 = arith.mulf %56, %57 : vector<32x1xf32>
    %cst_39 = arith.constant 0.000000e+00 : f32
    %59 = vector.broadcast %cst_39 : f32 to vector<32x1xf32>
    %60 = arith.maximumf %58, %59 : vector<32x1xf32>
    %61 = arith.addf %55, %60 : vector<32x1xf32>
    %cst_40 = arith.constant 9.99999997E-7 : f32
    %62 = vector.broadcast %cst_40 : f32 to vector<32x1xf32>
    %63 = arith.addf %61, %62 : vector<32x1xf32>
    %64 = arith.divf %55, %63 : vector<32x1xf32>
    %c0_41 = arith.constant 0 : index
    %c0_42 = arith.constant 0 : index
    %65 = vector.load %arg11[%c0_41, %c0_42] : memref<32x1xf32, #tpu.memory_space<vmem>>, vector<32x1xf32>
    %66 = arith.mulf %64, %65 : vector<32x1xf32>
    %67 = arith.mulf %66, %49 : vector<32x1xf32>
    %c0_43 = arith.constant 0 : index
    %68 = memref.load %arg14[%c0_43] : memref<2xf32, #tpu.memory_space<smem>>
    %69 = vector.broadcast %68 : f32 to vector<32x1xf32>
    %70 = arith.mulf %52, %69 : vector<32x1xf32>
    %c1 = arith.constant 1 : index
    %71 = memref.load %arg14[%c1] : memref<2xf32, #tpu.memory_space<smem>>
    %72 = vector.broadcast %71 : f32 to vector<32x1xf32>
    %73 = arith.mulf %67, %72 : vector<32x1xf32>
    %74 = arith.addf %70, %73 : vector<32x1xf32>
    %c0_44 = arith.constant 0 : index
    %75 = memref.load %arg15[%c0_44] : memref<1xf32, #tpu.memory_space<smem>>
    %76 = vector.broadcast %75 : f32 to vector<32x1xf32>
    %77 = arith.addf %74, %76 : vector<32x1xf32>
    %78 = arith.mulf %77, %49 : vector<32x1xf32>
    %c0_45 = arith.constant 0 : index
    %c0_46 = arith.constant 0 : index
    %79 = vector.load %arg9[%c0_45, %c0_46] : memref<4x32xf32, #tpu.memory_space<vmem>>, vector<4x32xf32>
    %cst_47 = arith.constant dense<0.000000e+00> : vector<4x1xf32>
    %80 = tpu.matmul %79, %78, %cst_47 {dimension_numbers = #tpu.dot_dimension_numbers<[1], [0], [0], [1], [0, 0, 1, 1], [], []>} : vector<4x32xf32>, vector<32x1xf32>, vector<4x1xf32> -> vector<4x1xf32>
    %c0_48 = arith.constant 0 : index
    %c0_49 = arith.constant 0 : index
    %81 = vector.load %arg17[%c0_48, %c0_49] : memref<4x1xf32, #tpu.memory_space<vmem>>, vector<4x1xf32>
    tpu.vector_store %arg17[%c0_48, %c0_49], %80 {strides = array<i32>} : memref<4x1xf32, #tpu.memory_space<vmem>>, vector<4x1xf32>,
    return
  }
}

</mosaic_0001>

<bundles_post_ra>
// kernel: tile.12
= control target key start
LH: loop header
LB: loop body
LE: loop exit
PB: predicated region body
PF: predicated region fallthrough
CT: control target
= control target key end

     0   :  { %vm18_vm0 = vcmask 1047556   ;;  %vm3_vm1 = vcmask 523264   ;;  %s73_s16 = smov 64   ;;  %vm22_vm2 = vcmask 1048064   ;;  %s114_s0 = inlined_call_operand.vmem [shape: f32[4,8,64], index: 0, kind: input, shape index: {}]   ;;  %s115_s1 = inlined_call_operand.vmem [shape: f32[4,512], index: 1, kind: output, shape index: {}]  }
   0x1   :  { %v65_v0 = vld [vmem:[%s114_s0 + $0x1] ss:$8 sm:$0xf]   ;;  %v66_v1 = vld [vmem:[%s114_s0 - $0x1d] ss:$8 sm:$0xf0]  }
   0x2   :  { %v67_v2 = vld [vmem:[%s114_s0 + $0x5] ss:$8 sm:$0xf]   ;;  %v19_v3 = vsel %vm18_vm0, %v66_v1, %v65_v0  ;;  %v68_v4 = vld [vmem:[%s114_s0 - $0x19] ss:$8 sm:$0xf0]  }
   0x3   :  { %v2_v5 = vld [vmem:[%s114_s0] ss:$2 sm:$0xff]   ;;  %20 = vrot.lane.b32.xlu0 %v19_v3, %s73_s16  ;;  %v64_v6 = vld [vmem:[%s114_s0 + $0x10] ss:$2 sm:$0xff]   ;;  %v31_v7 = vsel %vm18_vm0, %v68_v4, %v67_v2 }
   0x4   :  { %4 = vst.msk [vmem:[#allocation0] ss:$8 sm:$0xf] %vm3_vm1, %v2_v5   ;;  %6 = vst.msk [vmem:[#allocation0 - $0x1f] ss:$8 sm:$0xf0] %vm3_vm1, %v2_v5  }
   0x5   :  { %11 = vst.msk [vmem:[#allocation0 + $0x2] ss:$8 sm:$0xf] %vm3_vm1, %v64_v6   ;;  %13 = vst.msk [vmem:[#allocation0 - $0x1d] ss:$8 sm:$0xf0] %vm3_vm1, %v64_v6  }
   0x7   :  { %32 = vrot.lane.b32.xlu0 %v31_v7, %s73_s16 }
  0x75   :  { %v21_v8 = vpop.permute.xlu0 %20  }
  0x76   :  { %23 = vst.msk [vmem:[#allocation0] sm:$0xf] %vm22_vm2, %v21_v8   ;;  %25 = vst.msk [vmem:[#allocation0 + $0x4] sm:$0xf0] %vm22_vm2, %v21_v8  }
  0x79   :  { %v33_v9 = vpop.permute.xlu0 %32  }
  0x7a   :  { %36 = vst.msk [vmem:[#allocation0 + $0x10] sm:$0xf] %vm22_vm2, %v33_v9   ;;  %38 = vst.msk [vmem:[#allocation0 + $0x14] sm:$0xf0] %vm22_vm2, %v33_v9  }
  0x7d   :  { %v42_v10 = vld [vmem:[#allocation0] sm:$0xf]  ;;  %v46_v11 = vld [vmem:[#allocation0 + $0x8] sm:$0xf] }
  0x7e   :  { %44 = vst [vmem:[%s115_s1] sm:$0xf] %v42_v10  ;;  %69 = vst [vmem:[%s115_s1 + $0x4] sm:$0xf] %v46_v11 }
  0x81   :  { %v51_v12 = vld [vmem:[#allocation0 + $0x10] sm:$0xf]  ;;  %v57_v13 = vld [vmem:[#allocation0 + $0x18] sm:$0xf] }
  0x82   :  { %70 = vst [vmem:[%s115_s1 + $0x8] sm:$0xf] %v51_v12  ;;  %71 = vst [vmem:[%s115_s1 + $0xc] sm:$0xf] %v57_v13 }

// kernel: tile.17
= control target key start
LH: loop header
LB: loop body
LE: loop exit
PB: predicated region body
PF: predicated region fallthrough
CT: control target
= control target key end

     0   :  { %s13_s8 = smov 3  ;;  %s44_s9 = smov 96   ;;  %vm4_vm0 = vcmask 261120   ;;  %vm10_vm1 = vcmask 1048320   ;;  %vm17_vm2 = vcmask 785920   ;;  %vm24_vm3 = vcmask 523520   ;;  %s75_s0 = inlined_call_operand.vmem [shape: f32[7,32], index: 0, kind: input, shape index: {}]   ;;  %s76_s1 = inlined_call_operand.vmem [shape: f32[1,224], index: 1, kind: output, shape index: {}]  }
   0x1   :  { %v37_v0 = vld [vmem:[%s75_s0 + $0x3] sm:$0x1]   ;;  %s20_s10 = smov 3  ;;  %v38_v1 = vld [vmem:[%s75_s0 + $0x2] ss:$4 sm:%s13_s8]   ;;  %s2_s15 = smov 3 }
   0x2   :  { %8 = vrot.lane.b32.xlu0 %v37_v0, %s44_s9  ;;  %v39_v2 = vld [vmem:[%s75_s0 + $0x1] ss:$4 sm:%s20_s10]   ;;  %s45_s16 = smov 32  }
   0x3   :  { %22 = vrot.lane.b32.xlu1 %v39_v2, %s45_s16  ;;  %v3_v3 = vld [vmem:[%s75_s0] ss:$4 sm:%s2_s15]   ;;  %s46_s0 = smov 64  }
   0x4   :  { %5 = vst.msk [vmem:[#allocation0] ss:$8 sm:$0x3] %vm4_vm0, %v3_v3  }
   0x6   :  { %15 = vrot.lane.b32.xlu0 %v38_v1, %s46_s0 }
  0x74   :  { %v9_v4 = vpop.permute.xlu0 %8  }
  0x75   :  { %11 = vst.msk [vmem:[#allocation0] sm:$0x1] %vm10_vm1, %v9_v4   ;;  %v23_v5 = vpop.permute.xlu1 %22  }
  0x78   :  { %v16_v6 = vpop.permute.xlu0 %15  }
  0x79   :  { %18 = vst.msk [vmem:[#allocation0] ss:$8 sm:$0x3] %vm17_vm2, %v16_v6  }
  0x7a   :  { %25 = vst.msk [vmem:[#allocation0] ss:$8 sm:$0x3] %vm24_vm3, %v23_v5  }
  0x81   :  { %v29_v7 = vld [vmem:[#allocation0] sm:$0x1]  ;;  %v33_v8 = vld [vmem:[#allocation0 + $0x8] sm:$0x1] }
  0x82   :  { %31 = vst [vmem:[%s76_s1] sm:$0x1] %v29_v7  ;;  %40 = vst [vmem:[%s76_s1 + $0x1] sm:$0x1] %v33_v8 }

// kernel: ndrm3_forward.1
= control target key start
LH: loop header
LB: loop body
LE: loop exit
PB: predicated region body
PF: predicated region fallthrough
CT: control target
= control target key end

     0   :  { %s2782_s0 = inlined_call_operand.vmem [shape: f32[32,32], index: 0, kind: input, shape index: {}]   ;;  %s2783_s1 = inlined_call_operand.vmem [shape: f32[64,32], index: 1, kind: input, shape index: {}]   ;;  %s2784_s2 = inlined_call_operand.vmem [shape: f32[64,512], index: 2, kind: input, shape index: {}]   ;;  %s2785_s3 = inlined_call_operand.vmem [shape: f32[1,512], index: 3, kind: input, shape index: {}]   ;;  %s2786_s4 = inlined_call_operand.vmem [shape: f32[32,512], index: 4, kind: input, shape index: {}]   ;;  %s2787_s5 = inlined_call_operand.vmem [shape: f32[512,56], index: 5, kind: input, shape index: {}]   ;;  %s2788_s6 = inlined_call_operand.vmem [shape: f32[56,224], index: 6, kind: input, shape index: {}]   ;;  %s2789_s7 = inlined_call_operand.vmem [shape: f32[1,224], index: 7, kind: input, shape index: {}]   ;;  %s2790_s8 = inlined_call_operand.vmem [shape: f32[224,7], index: 8, kind: input, shape index: {}]   ;;  %s2791_s9 = inlined_call_operand.vmem [shape: f32[4,32], index: 9, kind: input, shape index: {}]   ;;  %s2792_s10 = inlined_call_operand.vmem [shape: f32[32,1], index: 10, kind: input, shape index: {}]   ;;  %s2793_s11 = inlined_call_operand.vmem [shape: f32[32,1], index: 11, kind: input, shape index: {}]   ;;  %s2794_s12 = inlined_call_operand.vmem [shape: f32[32,1], index: 12, kind: input, shape index: {}]   ;;  %s2795_s13 = inlined_call_operand.vmem [shape: f32[32,1], index: 13, kind: input, shape index: {}]   ;;  %s2796_s14 = inlined_call_operand.vmem [shape: f32[2], index: 14, kind: input, shape index: {}]   ;;  %s2797_s15 = inlined_call_operand.<no memory space> [shape: f32[1], index: 15, kind: input, shape index: {}]   ;;  %s2798_s16 = inlined_call_operand.<no memory space> [shape: f32[1], index: 16, kind: input, shape index: {}]   ;;  %s2799_s17 = inlined_call_operand.vmem [shape: f32[4,1], index: 17, kind: output, shape index: {}]  }
   0x1   :  { %2802 = sst [smem:[#allocation7_spill]] %s2782_s0 }
   0x2   :  { %2803 = sst [smem:[#allocation8_spill]] %s2783_s1 }
   0x3   :  { %24 = vsyncpa [#allocation5], 0  ;;  %s59_s26 = sshll.u32 %s2796_s14, 4  ;;  %s60_s26 = int_to_ptr.vmem [resolvable:$true] %s59_s26 }
   0x4   :  { %s1876_s27 = scalar_lea.vmem %s60_s26, 16  ;;  %p1881_p1 = scmp.lt.s32.totalorder %s60_s26, %s60_s26 }
   0x5   :  { %p1877_p0 = scmp.ne.s32.totalorder %s60_s26, %s1876_s27  ;;  %p1882_p2 = scmp.lt.s32.totalorder %s1876_s27, %s1876_s27 }
   0x7   :  { %p1883_p3 = por %p1882_p2, %p1881_p1 }
   0x9   :  { %p1884_p4 = pnand %p1883_p3, %p1877_p0 }
   0xb   :  { %1887 = shalt.err (!%p1884_p4)
}
   0xc   :  { %s1890_s28 = smov [#allocation4]  }
   0xd   :  { %62 = dma.vmem_to_smem %s60_s26, 16, %s1890_s28, [#allocation5]  }
   0xe   :  { %1888 = dma.done.wait [#allocation5], 16  }
   0xf   :  { %1889 = vsyncadd [#allocation5], 4294967280 }
  0x10   :  { %70 = sfence }
  0x11   :  { %s2804_s30 = sld [smem:[#allocation8_spill]]  ;;  %vm87_vm0 = vcmask 261120   ;;  %s2805_s18 = sld [smem:[#allocation7_spill]]  ;;  %v376_v36 = vld [vmem:[%s2784_s2 + $0x18] sm:$0xff]  ;;  %v375_v39 = vld [vmem:[%s2784_s2 + $0x10] sm:$0xff] }
  0x12   :  { %v380_v37 = vld [vmem:[%s2784_s2 + $0x38] sm:$0xff]  ;;  %v379_v40 = vld [vmem:[%s2784_s2 + $0x30] sm:$0xff]  ;;  %s1456_s26 = sld [smem:[#allocation4 + $0x1]]  ;;  %s1321_s27 = sld [smem:[#allocation4]] }
  0x13   :  { %v1636_v38 = vpack.c.bf16 %v380_v37, %v376_v36  ;;  %v1638_v41 = vpack.c.bf16 %v379_v40, %v375_v39  ;;  %v384_v42 = vld [vmem:[%s2784_s2 + $0x58] sm:$0xff]  ;;  %v383_v45 = vld [vmem:[%s2784_s2 + $0x50] sm:$0xff] }
  0x14   :  { %v388_v43 = vld [vmem:[%s2784_s2 + $0x78] sm:$0xff]  ;;  %v387_v46 = vld [vmem:[%s2784_s2 + $0x70] sm:$0xff] }
  0x15   :  { %1637 = vmatprep.subr.bf16.mxu1 %v1636_v38  ;;  %v1640_v44 = vpack.c.bf16 %v388_v43, %v384_v42  ;;  %v1642_v47 = vpack.c.bf16 %v387_v46, %v383_v45  ;;  %v392_v48 = vld [vmem:[%s2784_s2 + $0x98] sm:$0xff]  ;;  %v391_v51 = vld [vmem:[%s2784_s2 + $0x90] sm:$0xff] }
  0x16   :  { %1639 = vmatpush1.bf16.msra.mxu1 %v1638_v41  ;;  %v396_v49 = vld [vmem:[%s2784_s2 + $0xb8] sm:$0xff]  ;;  %v395_v52 = vld [vmem:[%s2784_s2 + $0xb0] sm:$0xff] }
  0x17   :  { %v1990_v0 = vld [vmem:[%s2804_s30 + $0x10] sm:$0xff]  ;;  %v1995_v1 = vld [vmem:[%s2804_s30] sm:$0xff]  ;;  %v2000_v2 = vld [vmem:[%s2804_s30 + $0x18] sm:$0xff]  ;;  %1641 = vmatprep.subr.bf16.mxu1 %v1640_v44  ;;  %v1644_v50 = vpack.c.bf16 %v396_v49, %v392_v48  ;;  %v1646_v54 = vpack.c.bf16 %v395_v52, %v391_v51 }
  0x18   :  { %v130_v3 = vmul.f32 %v1990_v0, %v1990_v0  ;;  %v128_v4 = vmul.f32 %v1995_v1, %v1995_v1  ;;  %v131_v5 = vmul.f32 %v2000_v2, %v2000_v2  ;;  %v2011_v6 = vld [vmem:[%s2804_s30 + $0x8] sm:$0xff]  ;;  %v2023_v9 = vld [vmem:[%s2804_s30 + $0x20] sm:$0xff]  ;;  %v2036_v16 = vld [vmem:[%s2804_s30 + $0x38] sm:$0xff] }
  0x19   :  { %v129_v7 = vmul.f32 %v2011_v6, %v2011_v6  ;;  %v2018_v8 = vld [vmem:[%s2804_s30 + $0x28] sm:$0xff]  ;;  %v132_v15 = vmul.f32 %v2023_v9, %v2023_v9  ;;  %v2041_v17 = vld [vmem:[%s2804_s30 + $0x30] sm:$0xff]  ;;  %v135_v20 = vmul.f32 %v2036_v16, %v2036_v16  ;;  %v2052_v22 = vld [vmem:[%s2805_s18] sm:$0xff] }
  0x1a   :  { %v142_v10 = vsel %vm87_vm0, %v130_v3, 0.0  ;;  %v136_v11 = vsel %vm87_vm0, %v128_v4, 0.0  ;;  %v145_v12 = vsel %vm87_vm0, %v131_v5, 0.0  ;;  %v133_v14 = vmul.f32 %v2018_v8, %v2018_v8  ;;  %v2057_v23 = vld [vmem:[%s2805_s18 + $0x8] sm:$0xff]  ;;  %v2068_v28 = vld [vmem:[%s2805_s18 + $0x10] sm:$0xff]  ;;  %v2073_v29 = vld [vmem:[%s2805_s18 + $0x18] sm:$0xff]  ;;  %1643 = vmatpush1.bf16.msra.mxu1 %v1642_v47 }
  0x1b   :  { %143 = vadd.xlane.f32.xlu1 %v142_v10  ;;  %137 = vadd.xlane.f32.xlu0 %v136_v11  ;;  %v139_v13 = vsel %vm87_vm0, %v129_v7, 0.0  ;;  %v148_v19 = vsel %vm87_vm0, %v132_v15, 0.0  ;;  %v134_v21 = vmul.f32 %v2041_v17, %v2041_v17  ;;  %v157_v24 = vsel %vm87_vm0, %v135_v20, 0.0  ;;  %v400_v53 = vld [vmem:[%s2784_s2 + $0xd8] sm:$0xff]  ;;  %v399_v57 = vld [vmem:[%s2784_s2 + $0xd0] sm:$0xff] }
  0x1c   :  { %v151_v18 = vsel %vm87_vm0, %v133_v14, 0.0  ;;  %v83_v26 = vmul.f32 %v2052_v22, %v2052_v22  ;;  %v84_v27 = vmul.f32 %v2057_v23, %v2057_v23  ;;  %v85_v32 = vmul.f32 %v2068_v28, %v2068_v28  ;;  %v404_v55 = vld [vmem:[%s2784_s2 + $0xf8] sm:$0xff]  ;;  %1645 = vmatprep.subr.bf16.mxu1 %v1644_v50  ;;  %v403_v58 = vld [vmem:[%s2784_s2 + $0xf0] sm:$0xff] }
  0x1d   :  { %v154_v25 = vsel %vm87_vm0, %v134_v21, 0.0  ;;  %v86_v33 = vmul.f32 %v2073_v29, %v2073_v29  ;;  %v1648_v56 = vpack.c.bf16 %v404_v55, %v400_v53  ;;  %v1650_v59 = vpack.c.bf16 %v403_v58, %v399_v57 }
  0x1e   :  { %v88_v30 = vsel %vm87_vm0, %v83_v26, 0.0  ;;  %v91_v31 = vsel %vm87_vm0, %v84_v27, 0.0  ;;  %v94_v34 = vsel %vm87_vm0, %v85_v32, 0.0  ;;  %1647 = vmatpush1.bf16.msra.mxu1 %v1646_v54 }
  0x1f   :  { %146 = vadd.xlane.f32.xlu1 %v145_v12  ;;  %140 = vadd.xlane.f32.xlu0 %v139_v13  ;;  %v97_v35 = vsel %vm87_vm0, %v86_v33, 0.0 }
  0x20   :  { %1649 = vmatprep.subr.bf16.mxu1 %v1648_v56 }
  0x22   :  { %1651 = vmatpush1.bf16.msra.mxu1 %v1650_v59 }
  0x23   :  { %152 = vadd.xlane.f32.xlu1 %v151_v18  ;;  %149 = vadd.xlane.f32.xlu0 %v148_v19 }
  0x27   :  { %158 = vadd.xlane.f32.xlu1 %v157_v24  ;;  %155 = vadd.xlane.f32.xlu0 %v154_v25 }
  0x2b   :  { %89 = vadd.xlane.f32.xlu0 %v88_v30  ;;  %92 = vadd.xlane.f32.xlu1 %v91_v31 }
  0x2f   :  { %95 = vadd.xlane.f32.xlu0 %v94_v34  ;;  %98 = vadd.xlane.f32.xlu1 %v97_v35 }
  0xa8   :  { %v144_v60 = vpop.xlane.xlu1 %143  ;;  %v138_v61 = vpop.xlane.xlu0 %137 }
  0xa9   :  { %1780 = vrsqrt.f32 %v144_v60  ;;  %vm176_vm1 = vcmp.eq.f32.partialorder %v144_v60, inf  ;;  %vm178_vm2 = vcmp.eq.f32.partialorder %v144_v60, 0.0  ;;  %v179_v15 = vand.u32 2147483648, %v144_v60 }
  0xaa   :  { %1782 = vrsqrt.f32 %v138_v61  ;;  %vm162_vm3 = vcmp.eq.f32.partialorder %v138_v61, inf  ;;  %vm164_vm4 = vcmp.eq.f32.partialorder %v138_v61, 0.0  ;;  %v165_v32 = vand.u32 2147483648, %v138_v61 }
  0xac   :  { %v147_v62 = vpop.xlane.xlu1 %146  ;;  %v141_v63 = vpop.xlane.xlu0 %140 }
  0xad   :  { %1784 = vrsqrt.f32 %v147_v62  ;;  %vm183_vm5 = vcmp.eq.f32.partialorder %v147_v62, inf  ;;  %v186_v27 = vand.u32 2147483648, %v147_v62  ;;  %vm169_vm6 = vcmp.eq.f32.partialorder %v141_v63, inf }
  0xae   :  { %1786 = vrsqrt.f32 %v141_v63  ;;  %vm185_vm7 = vcmp.eq.f32.partialorder %v147_v62, 0.0  ;;  %v172_v36 = vand.u32 2147483648, %v141_v63  ;;  %vm171_vm9 = vcmp.eq.f32.partialorder %v141_v63, 0.0 }
  0xb0   :  { %v153_v3 = vpop.xlane.xlu1 %152  ;;  %v2131_v4 = vpop.xlane.xlu0 %149 }
  0xb1   :  { %1788 = vrsqrt.f32 %v153_v3  ;;  %vm197_vm8 = vcmp.eq.f32.partialorder %v153_v3, inf  ;;  %v200_v42 = vand.u32 2147483648, %v153_v3  ;;  %vm190_vm10 = vcmp.eq.f32.partialorder %v2131_v4, inf }
  0xb2   :  { %1790 = vrsqrt.f32 %v2131_v4  ;;  %vm199_vm11 = vcmp.eq.f32.partialorder %v153_v3, 0.0  ;;  %v193_v46 = vand.u32 2147483648, %v2131_v4  ;;  %vm192_vm12 = vcmp.eq.f32.partialorder %v2131_v4, 0.0 }
  0xb3   :  { %v1781_v5 = vpop.eup %1780 }
  0xb4   :  { %v1783_v7 = vpop.eup %1782  ;;  %v175_v10 = vmul.f32 %v1781_v5, %v144_v60  ;;  %v2134_v11 = vpop.xlane.xlu1 %158 }
  0xb5   :  { %v2136_v12 = vpop.xlane.xlu0 %155  ;;  %v161_v13 = vmul.f32 %v1783_v7, %v138_v61  ;;  %1792 = vrsqrt.f32 %v2134_v11  ;;  %vm211_vm15 = vcmp.eq.f32.partialorder %v2134_v11, inf }
  0xb6   :  { %v177_v19 = vsel %vm176_vm1, %v144_v60, %v175_v10  ;;  %1794 = vrsqrt.f32 %v2136_v12  ;;  %vm213_vm1 = vcmp.eq.f32.partialorder %v2134_v11, 0.0  ;;  %v207_v5 = vand.u32 2147483648, %v2136_v12 }
  0xb7   :  { %v1785_v14 = vpop.eup %1784  ;;  %v163_v25 = vsel %vm162_vm3, %v138_v61, %v161_v13  ;;  %v180_v31 = vsel %vm178_vm2, %v179_v15, %v177_v19  ;;  %vm204_vm2 = vcmp.eq.f32.partialorder %v2136_v12, inf  ;;  %vm206_vm3 = vcmp.eq.f32.partialorder %v2136_v12, 0.0 }
  0xb8   :  { %v1787_v18 = vpop.eup %1786  ;;  %v182_v20 = vmul.f32 %v1785_v14, %v147_v62  ;;  %v166_v38 = vsel %vm164_vm4, %v165_v32, %v163_v25  ;;  %v230_v40 = vmax.f32 %v180_v31, 1e-08  ;;  %v2148_v57 = vpop.xlane.xlu1 %92  ;;  %vm2171_vm4 = vmpackc.low %vm87_vm0, %vm87_vm0 }
  0xb9   :  { %v90_v21 = vpop.xlane.xlu0 %89  ;;  %v168_v24 = vmul.f32 %v1787_v18, %v141_v63  ;;  %v228_v45 = vmax.f32 %v166_v38, 1e-08 }
  0xba   :  { %1796 = vrsqrt.f32 %v90_v21  ;;  %v184_v26 = vsel %vm183_vm5, %v147_v62, %v182_v20  ;;  %vm102_vm13 = vcmp.eq.f32.partialorder %v90_v21, inf  ;;  %vm104_vm14 = vcmp.eq.f32.partialorder %v90_v21, 0.0 }
  0xbb   :  { %v1789_v30 = vpop.eup %1788  ;;  %v170_v33 = vsel %vm169_vm6, %v141_v63, %v168_v24  ;;  %v187_v35 = vsel %vm185_vm7, %v186_v27, %v184_v26  ;;  %1798 = vrcp.f32 %v230_v40  ;;  %v105_v53 = vand.u32 2147483648, %v90_v21 }
  0xbc   :  { %v1791_v34 = vpop.eup %1790  ;;  %v196_v37 = vmul.f32 %v1789_v30, %v153_v3  ;;  %v173_v41 = vsel %vm171_vm9, %v172_v36, %v170_v33  ;;  %v231_v43 = vmax.f32 %v187_v35, 1e-08  ;;  %v214_v63 = vand.u32 2147483648, %v2134_v11  ;;  %v99_v14 = vpop.xlane.xlu1 %98 }
  0xbd   :  { %v189_v39 = vmul.f32 %v1791_v34, %v2131_v4  ;;  %v229_v48 = vmax.f32 %v173_v41, 1e-08  ;;  %v2152_v60 = vpop.xlane.xlu0 %95  ;;  %vm109_vm5 = vcmp.eq.f32.partialorder %v2148_v57, inf  ;;  %vm111_vm7 = vcmp.eq.f32.partialorder %v2148_v57, 0.0 }
  0xbe   :  { %v198_v44 = vsel %vm197_vm8, %v153_v3, %v196_v37  ;;  %1800 = vrcp.f32 %v231_v43  ;;  %vm116_vm6 = vcmp.eq.f32.partialorder %v2152_v60, inf  ;;  %v119_v41 = vand.u32 2147483648, %v2152_v60 }
  0xbf   :  { %v1793_v47 = vpop.eup %1792  ;;  %v191_v49 = vsel %vm190_vm10, %v2131_v4, %v189_v39  ;;  %v201_v51 = vsel %vm199_vm11, %v200_v42, %v198_v44  ;;  %1802 = vrcp.f32 %v228_v45  ;;  %vm118_vm8 = vcmp.eq.f32.partialorder %v2152_v60, 0.0 }
  0xc0   :  { %v1795_v50 = vpop.eup %1794  ;;  %v194_v54 = vsel %vm192_vm12, %v193_v46, %v191_v49  ;;  %v210_v55 = vmul.f32 %v1793_v47, %v2134_v11  ;;  %v233_v58 = vmax.f32 %v201_v51, 1e-08  ;;  %1804 = vrcp.f32 %v229_v48 }
  0xc1   :  { %v203_v59 = vmul.f32 %v1795_v50, %v2136_v12  ;;  %v232_v62 = vmax.f32 %v194_v54, 1e-08  ;;  %1806 = vrsqrt.f32 %v2148_v57  ;;  %vm123_vm9 = vcmp.eq.f32.partialorder %v99_v14, inf }
  0xc2   :  { %v212_v4 = vsel %vm211_vm15, %v2134_v11, %v210_v55  ;;  %1808 = vrsqrt.f32 %v2152_v60  ;;  %v126_v46 = vand.u32 2147483648, %v99_v14  ;;  %vm125_vm10 = vcmp.eq.f32.partialorder %v99_v14, 0.0  ;;  %v762_v11 = vld [vmem:[%s2787_s5 + $0x80] sm:$0xff] }
  0xc3   :  { %1810 = vrcp.f32 %v233_v58  ;;  %v205_v10 = vsel %vm204_vm2, %v2136_v12, %v203_v59  ;;  %v215_v13 = vsel %vm213_vm1, %v214_v63, %v212_v4  ;;  %v377_v58 = vld [vmem:[%s2784_s2 + $0x20] sm:$0xff]  ;;  %vm405_vm11 = vcmask 523264  }
  0xc4   :  { %v1797_v52 = vpop.eup %1796  ;;  %v208_v18 = vsel %vm206_vm3, %v207_v5, %v205_v10  ;;  %v381_v5 = vld [vmem:[%s2784_s2 + $0x40] sm:$0xff]  ;;  %vm1014_vm12 = vcmask 457728   ;;  %vm1893_vm15 = vmmov 0   ;;  %vm1421_vm1 = vcmask 3072  }
  0xc5   :  { %v101_v56 = vmul.f32 %v1797_v52, %v90_v21  ;;  %v1799_v15 = vpop.eup %1798  ;;  %v234_v25 = vmax.f32 %v208_v18, 1e-08 }
  0xc6   :  { %v241_v33 = vmul.f32 %v1799_v15, %v1990_v0 }
  0xc7   :  { %v103_v61 = vsel %vm102_vm13, %v90_v21, %v101_v56  ;;  %v235_v21 = vmax.f32 %v215_v13, 1e-08  ;;  %v374_v56 = vld [vmem:[%s2784_s2 + $0x8] sm:$0xff]  ;;  %vm1154_vm13 = vcmask 785408  }
  0xc8   :  { %v106_v3 = vsel %vm104_vm14, %v105_v53, %v103_v61  ;;  %v1801_v19 = vpop.eup %1800  ;;  %v386_v61 = vld [vmem:[%s2784_s2 + $0x68] sm:$0xff]  ;;  %vm1256_vm14 = vcmask 56320  }
  0xc9   :  { %v216_v7 = vmax.f32 %v106_v3, 1e-08  ;;  %v1803_v20 = vpop.eup %1802  ;;  %v243_v12 = vmul.f32 %v1801_v19, %v2000_v2 }
  0xca   :  { %v1805_v24 = vpop.eup %1804  ;;  %v237_v26 = vmul.f32 %v1803_v20, %v1995_v1  ;;  %v393_v20 = vld [vmem:[%s2784_s2 + $0xa0] sm:$0xff] }
  0xcb   :  { %1812 = vrcp.f32 %v216_v7  ;;  %v239_v27 = vmul.f32 %v1805_v24, %v2011_v6  ;;  %v1807_v30 = vpop.eup %1806  ;;  %v1602_v1 = vpack.c.bf16 %v243_v12, %v241_v33  ;;  %v385_v7 = vld [vmem:[%s2784_s2 + $0x60] sm:$0xff]  ;;  %v402_v24 = vld [vmem:[%s2784_s2 + $0xe8] sm:$0xff] }
  0xcc   :  { %1814 = vrcp.f32 %v232_v62  ;;  %v1809_v31 = vpop.eup %1808  ;;  %v108_v36 = vmul.f32 %v1807_v30, %v2148_v57  ;;  %v1626_v15 = vpack.c.bf16 %v385_v7, %v381_v5  ;;  %v1891_v30 = vmov 0.0   ;;  %v752_v5 = vld [vmem:[%s2787_s5 + $0x30] sm:$0xff]  ;;  %v753_v7 = vld [vmem:[%s2787_s5 + $0x38] sm:$0xff] }
  0xcd   :  { %1816 = vrsqrt.f32 %v99_v14  ;;  %v1596_v32 = vpack.c.bf16 %v239_v27, %v237_v26  ;;  %v1811_v34 = vpop.eup %1810  ;;  %v115_v37 = vmul.f32 %v1809_v31, %v2152_v60  ;;  %v397_v26 = vld [vmem:[%s2784_s2 + $0xc0] sm:$0xff]  ;;  %571 = vmatprep.mubr.f32.mxu1 %v1891_v30  ;;  %v763_v31 = vld [vmem:[%s2787_s5 + $0x88] sm:$0xff] }
  0xce   :  { %1818 = vrcp.f32 %v235_v21  ;;  %v247_v39 = vmul.f32 %v1811_v34, %v2018_v8  ;;  %v110_v40 = vsel %vm109_vm5, %v2148_v57, %v108_v36  ;;  %v398_v21 = vld [vmem:[%s2784_s2 + $0xc8] sm:$0xff]  ;;  %v401_v27 = vld [vmem:[%s2784_s2 + $0xe0] sm:$0xff]  ;;  %v1652_v33 = vpack.c.bf16 %v763_v31, %v762_v11  ;;  %v772_v31 = vld [vmem:[%s2787_s5 + $0xd0] sm:$0xff] }
  0xcf   :  { %1820 = vrcp.f32 %v234_v25  ;;  %1598 = vmatprep.subr.msk.bf16.mxu0 %vm2171_vm4, %v1596_v32  ;;  %v117_v44 = vsel %vm116_vm6, %v2152_v60, %v115_v37  ;;  %v382_v60 = vld [vmem:[%s2784_s2 + $0x48] sm:$0xff]  ;;  %v1632_v25 = vpack.c.bf16 %v402_v24, %v398_v21  ;;  %v1634_v12 = vpack.c.bf16 %v401_v27, %v397_v26  ;;  %v765_v37 = vld [vmem:[%s2787_s5 + $0x98] sm:$0xff]  ;;  %v754_v24 = vld [vmem:[%s2787_s5 + $0x40] sm:$0xff] }
  0xd0   :  { %1601 = vmatpush3.bf16.xpose.msk.msra.mxu0 %vm2171_vm4, %v1596_v32  ;;  %v120_v47 = vsel %vm118_vm8, %v119_v41, %v117_v44  ;;  %v1624_v4 = vpack.c.bf16 %v386_v61, %v382_v60  ;;  %v794_v32 = vld [vmem:[%s2787_s5 + $0x180] sm:$0xff]  ;;  %v795_v34 = vld [vmem:[%s2787_s5 + $0x188] sm:$0xff]  ;;  %v768_v61 = vld [vmem:[%s2787_s5 + $0xb0] sm:$0xff] }
  0xd1   :  { %1604 = vmatprep.subr.msk.bf16.mxu0 %vm2171_vm4, %v1602_v1  ;;  %v218_v52 = vmax.f32 %v120_v47, 1e-08  ;;  %v779_v36 = vld [vmem:[%s2787_s5 + $0x108] sm:$0xff]  ;;  %v786_v27 = vld [vmem:[%s2787_s5 + $0x140] sm:$0xff] }
  0xd2   :  { %v803_v21 = vld [vmem:[%s2787_s5 + $0x1c8] sm:$0xff] }
  0xd5   :  { %v1813_v35 = vpop.eup %1812 }
  0xd6   :  { %v1815_v2 = vpop.eup %1814  ;;  %v221_v6 = vmul.f32 %v1813_v35, %v2052_v22  ;;  %v112_v22 = vand.u32 2147483648, %v2148_v57  ;;  %v373_v57 = vld [vmem:[%s2784_s2] sm:$0xff]  ;;  %v1684_v35 = vpack.c.bf16 %v795_v34, %v794_v32  ;;  %v773_v32 = vld [vmem:[%s2787_s5 + $0xd8] sm:$0xff] }
  0xd7   :  { %v1817_v0 = vpop.eup %1816  ;;  %v245_v38 = vmul.f32 %v1815_v2, %v2023_v9  ;;  %v1622_v63 = vpack.c.bf16 %v377_v58, %v373_v57  ;;  %v747_v2 = vld [vmem:[%s2787_s5 + $0x8] sm:$0xff]  ;;  %v782_v58 = vld [vmem:[%s2787_s5 + $0x120] sm:$0xff]  ;;  %v1672_v34 = vpack.c.bf16 %v773_v32, %v772_v31 }
  0xd8   :  { %1579 = vmatprep.mubr.msk.f32.mxu0 %vm87_vm0, %v221_v6  ;;  %v122_v42 = vmul.f32 %v1817_v0, %v99_v14  ;;  %v1819_v43 = vpop.eup %1818  ;;  %1607 = vmatpush3.bf16.xpose.msk.msra.mxu0 %vm2171_vm4, %v1602_v1  ;;  %v113_v8 = vsel %vm111_vm7, %v112_v22, %v110_v40  ;;  %v746_v1 = vld [vmem:[%s2787_s5] sm:$0xff]  ;;  %v764_v0 = vld [vmem:[%s2787_s5 + $0x90] sm:$0xff] }
  0xd9   :  { %v1608_v9 = vpack.c.bf16 %v247_v39, %v245_v38  ;;  %v1821_v45 = vpop.eup %1820  ;;  %v251_v50 = vmul.f32 %v1819_v43, %v2036_v16  ;;  %v217_v51 = vmax.f32 %v113_v8, 1e-08  ;;  %v378_v16 = vld [vmem:[%s2784_s2 + $0x28] sm:$0xff]  ;;  %1685 = vmatprep.subr.bf16.mxu1 %v1684_v35  ;;  %v778_v6 = vld [vmem:[%s2787_s5 + $0x100] sm:$0xff]  ;;  %v796_v38 = vld [vmem:[%s2787_s5 + $0x190] sm:$0xff]  ;;  %v1654_v40 = vpack.c.bf16 %v747_v2, %v746_v1 }
  0xda   :  { %v124_v48 = vsel %vm123_vm9, %v99_v14, %v122_v42  ;;  %v249_v49 = vmul.f32 %v1821_v45, %v2041_v17  ;;  %v1620_v17 = vpack.c.bf16 %v378_v16, %v374_v56  ;;  %v390_v14 = vld [vmem:[%s2784_s2 + $0x88] sm:$0xff]  ;;  %v797_v39 = vld [vmem:[%s2787_s5 + $0x198] sm:$0xff]  ;;  %v1686_v41 = vpack.c.bf16 %v779_v36, %v778_v6  ;;  %v748_v42 = vld [vmem:[%s2787_s5 + $0x10] sm:$0xff] }
  0xdb   :  { %1610 = vmatprep.subr.msk.bf16.mxu0 %vm2171_vm4, %v1608_v9  ;;  %v127_v53 = vsel %vm125_vm10, %v126_v46, %v124_v48  ;;  %1822 = vrcp.f32 %v217_v51  ;;  %v1656_v44 = vpack.c.bf16 %v765_v37, %v764_v0  ;;  %v749_v45 = vld [vmem:[%s2787_s5 + $0x18] sm:$0xff]  ;;  %v780_v8 = vld [vmem:[%s2787_s5 + $0x110] sm:$0xff]  ;;  %v766_v51 = vld [vmem:[%s2787_s5 + $0xa0] sm:$0xff] }
  0xdc   :  { %v1614_v54 = vpack.c.bf16 %v251_v50, %v249_v49  ;;  %v219_v55 = vmax.f32 %v127_v53, 1e-08  ;;  %1824 = vrcp.f32 %v218_v52  ;;  %v781_v46 = vld [vmem:[%s2787_s5 + $0x118] sm:$0xff]  ;;  %v1658_v48 = vpack.c.bf16 %v749_v45, %v748_v42  ;;  %v767_v52 = vld [vmem:[%s2787_s5 + $0xa8] sm:$0xff]  ;;  %v798_v53 = vld [vmem:[%s2787_s5 + $0x1a0] sm:$0xff] }
  0xdd   :  { %v1690_v49 = vpack.c.bf16 %v781_v46, %v780_v8  ;;  %v750_v56 = vld [vmem:[%s2787_s5 + $0x20] sm:$0xff]  ;;  %v751_v16 = vld [vmem:[%s2787_s5 + $0x28] sm:$0xff]  ;;  %v805_v35 = vld [vmem:[%s2787_s5 + $0x1d8] sm:$0xff] }
  0xde   :  { %1826 = vrcp.f32 %v219_v55  ;;  %v799_v55 = vld [vmem:[%s2787_s5 + $0x1a8] sm:$0xff]  ;;  %v1662_v57 = vpack.c.bf16 %v751_v16, %v750_v56  ;;  %v756_v1 = vld [vmem:[%s2787_s5 + $0x50] sm:$0xff]  ;;  %v757_v2 = vld [vmem:[%s2787_s5 + $0x58] sm:$0xff] }
  0xdf   :  { %v1674_v36 = vpack.c.bf16 %v757_v2, %v756_v1  ;;  %v788_v0 = vld [vmem:[%s2787_s5 + $0x150] sm:$0xff]  ;;  %v789_v37 = vld [vmem:[%s2787_s5 + $0x158] sm:$0xff]  ;;  %v807_v42 = vld [vmem:[%s2787_s5 + $0x1e8] sm:$0xff] }
  0xe0   :  { %1613 = vmatpush3.bf16.xpose.msk.msra.mxu0 %vm2171_vm4, %v1608_v9  ;;  %v1688_v9 = vpack.c.bf16 %v797_v39, %v796_v38  ;;  %v1706_v38 = vpack.c.bf16 %v789_v37, %v788_v0  ;;  %v774_v39 = vld [vmem:[%s2787_s5 + $0xe0] sm:$0xff]  ;;  %v791_v46 = vld [vmem:[%s2787_s5 + $0x168] sm:$0xff]  ;;  %v792_v16 = vld [vmem:[%s2787_s5 + $0x170] sm:$0xff] }
  0xe1   :  { %1616 = vmatprep.subr.msk.bf16.mxu0 %vm2171_vm4, %v1614_v54  ;;  %v790_v8 = vld [vmem:[%s2787_s5 + $0x160] sm:$0xff] }
  0xe5   :  { %v1823_v59 = vpop.eup %1822 }
  0xe6   :  { %v1825_v62 = vpop.eup %1824  ;;  %v223_v3 = vmul.f32 %v1823_v59, %v2057_v23  ;;  %v394_v23 = vld [vmem:[%s2784_s2 + $0xa8] sm:$0xff] }
  0xe7   :  { %v225_v13 = vmul.f32 %v1825_v62, %v2068_v28  ;;  %v1628_v19 = vpack.c.bf16 %v394_v23, %v390_v14  ;;  %v389_v28 = vld [vmem:[%s2784_s2 + $0x80] sm:$0xff]  ;;  %v783_v59 = vld [vmem:[%s2787_s5 + $0x128] sm:$0xff]  ;;  %v769_v62 = vld [vmem:[%s2787_s5 + $0xb8] sm:$0xff] }
  0xe8   :  { %1619 = vmatpush3.bf16.xpose.msk.msra.mxu0 %vm2171_vm4, %v1614_v54  ;;  %v1827_v10 = vpop.eup %1826  ;;  %v1660_v54 = vpack.c.bf16 %v767_v52, %v766_v51  ;;  %v1694_v60 = vpack.c.bf16 %v783_v59, %v782_v58  ;;  %v784_v14 = vld [vmem:[%s2787_s5 + $0x130] sm:$0xff]  ;;  %v785_v23 = vld [vmem:[%s2787_s5 + $0x138] sm:$0xff]  ;;  %v598_v58 = vlaneseq }
  0xe9   :  { %1621 = vmatprep.subr.bf16.mxu0 %v1620_v17  ;;  %v227_v18 = vmul.f32 %v1827_v10, %v2073_v29  ;;  %v1630_v29 = vpack.c.bf16 %v393_v20, %v389_v28  ;;  %v1692_v17 = vpack.c.bf16 %v799_v55, %v798_v53  ;;  %v802_v28 = vld [vmem:[%s2787_s5 + $0x1c0] sm:$0xff]  ;;  %v809_v52 = vld [vmem:[%s2787_s5 + $0x1f8] sm:$0xff]  ;;  %v760_v53 = vld [vmem:[%s2787_s5 + $0x70] sm:$0xff] }
  0xea   :  { %v2470_v59 = vshrl.u32 %v598_v58, 7 }
  0xef   :  { %1580 = vmatmul.mubr.msk.f32.vlgmr.msra.gmra.mrb[0].mxu0 %vm87_vm0, %v223_v3  ;;  %v1664_v3 = vpack.c.bf16 %v769_v62, %v768_v61  ;;  %v608_v61 = vsub.s32 2, %v2470_v59  ;;  %v596_v62 = vld [vmem:[%s2785_s3] sm:$0xf] }
  0xf0   :  { %1582 = vmatprep.mubr.msk.f32.mxu0 %vm87_vm0, %v225_v13  ;;  %1623 = vmatpush1.bf16.msra.mxu0 %v1622_v63  ;;  %v800_v63 = vld [vmem:[%s2787_s5 + $0x1b0] sm:$0xff]  ;;  %v1666_v13 = vpack.c.bf16 %v753_v7, %v752_v5 }
  0xf1   :  { %1625 = vmatprep.subr.bf16.mxu0 %v1624_v4  ;;  %v801_v4 = vld [vmem:[%s2787_s5 + $0x1b8] sm:$0xff]  ;;  %v2483_v5 = vrot.slane %v596_v62, %v608_v61 }
  0xf2   :  { %v1696_v10 = vpack.c.bf16 %v801_v4, %v800_v63  ;;  %v604_v63 = vsub.s32 1, %v2470_v59 }
  0xf3   :  { %1583 = vmatmul.mubr.msk.f32.gmra.mrb[2].mxu0 %vm87_vm0, %v227_v18  ;;  %v770_v18 = vld [vmem:[%s2787_s5 + $0xc0] sm:$0xff] }
  0xf4   :  { %1627 = vmatpush1.bf16.msra.mxu0 %v1626_v15  ;;  %482 = vmatprep.mubr.f32.mxu0 %v1891_v30  ;;  %v1698_v15 = vpack.c.bf16 %v785_v23, %v784_v14  ;;  %v2487_v7 = vrot.slane %v596_v62, %v604_v63 }
  0xf5   :  { %1629 = vmatprep.subr.bf16.mxu0 %v1628_v19  ;;  %v771_v19 = vld [vmem:[%s2787_s5 + $0xc8] sm:$0xff] }
  0xf6   :  { %v1668_v20 = vpack.c.bf16 %v771_v19, %v770_v18 }
  0xf8   :  { %1631 = vmatpush1.bf16.msra.mxu0 %v1630_v29  ;;  %v755_v29 = vld [vmem:[%s2787_s5 + $0x48] sm:$0xff] }
  0xf9   :  { %1633 = vmatprep.subr.bf16.mxu0 %v1632_v25  ;;  %v1700_v25 = vpack.c.bf16 %v803_v21, %v802_v28  ;;  %v1670_v26 = vpack.c.bf16 %v755_v29, %v754_v24 }
  0xfc   :  { %1635 = vmatpush1.bf16.msra.mxu0 %v1634_v12  ;;  %v787_v12 = vld [vmem:[%s2787_s5 + $0x148] sm:$0xff] }
  0xfd   :  { %1653 = vmatprep.subr.bf16.mxu0 %v1652_v33  ;;  %v1702_v11 = vpack.c.bf16 %v787_v12, %v786_v27  ;;  %v804_v33 = vld [vmem:[%s2787_s5 + $0x1d0] sm:$0xff] }
  0xfe   :  { %v1704_v6 = vpack.c.bf16 %v805_v35, %v804_v33 }
 0x1c2   :  { %v1581_v22 = vpop.f32.mrb[0].mxu0 }
 0x1c3   :  { %v354_v43 = vpop.f32.mrb[1].mxu0 }
 0x1c4   :  { %1440 = vmatmul.mubr.msk.f32.vlgmr.msra.gmra.mrb[4].mxu0 %vm405_vm11, %v354_v43  ;;  %1444 = vmatmul.mubr.msk.f32.vlgmr.msra.gmra.mrb[0].mxu1 %vm405_vm11, %v354_v43  ;;  %v758_v43 = vld [vmem:[%s2787_s5 + $0x60] sm:$0xff] }
 0x1c5   :  { %488 = vmatprep.mubr.f32.mxu0 %v1891_v30  ;;  %577 = vmatprep.mubr.f32.mxu1 %v1891_v30 }
 0x1c6   :  { %v1584_v47 = vpop.f32.mrb[2].mxu0  ;;  %1655 = vmatpush3.bf16.msra.mxu0 %v1654_v40  ;;  %1687 = vmatpush3.bf16.msra.mxu1 %v1686_v41  ;;  %v806_v40 = vld [vmem:[%s2787_s5 + $0x1e0] sm:$0xff] }
 0x1c7   :  { %v364_v50 = vpop.f32.mrb[3].mxu0  ;;  %1657 = vmatprep.subr.bf16.mxu0 %v1656_v44  ;;  %1689 = vmatprep.subr.bf16.mxu1 %v1688_v9  ;;  %v759_v44 = vld [vmem:[%s2787_s5 + $0x68] sm:$0xff]  ;;  %v1708_v9 = vpack.c.bf16 %v807_v42, %v806_v40 }
 0x1c8   :  { %1441 = vmatmul.mubr.msk.f32.gmra.mrb[6].mxu0 %vm405_vm11, %v1581_v22  ;;  %1445 = vmatmul.mubr.msk.f32.gmra.mrb[2].mxu1 %vm405_vm11, %v1581_v22  ;;  %v775_v22 = vld [vmem:[%s2787_s5 + $0xe8] sm:$0xff]  ;;  %v1678_v45 = vpack.c.bf16 %v759_v44, %v758_v43 }
 0x1c9   :  { %494 = vmatprep.mubr.f32.mxu0 %v1891_v30  ;;  %583 = vmatprep.mubr.f32.mxu1 %v1891_v30  ;;  %v1676_v41 = vpack.c.bf16 %v775_v22, %v774_v39 }
 0x1ca   :  { %1659 = vmatpush3.bf16.msra.mxu0 %v1658_v48  ;;  %1691 = vmatpush3.bf16.msra.mxu1 %v1690_v49  ;;  %v776_v48 = vld [vmem:[%s2787_s5 + $0xf0] sm:$0xff]  ;;  %v777_v49 = vld [vmem:[%s2787_s5 + $0xf8] sm:$0xff] }
 0x1cb   :  { %1661 = vmatprep.subr.bf16.mxu0 %v1660_v54  ;;  %1693 = vmatprep.subr.bf16.mxu1 %v1692_v17  ;;  %v1680_v51 = vpack.c.bf16 %v777_v49, %v776_v48  ;;  %v761_v54 = vld [vmem:[%s2787_s5 + $0x78] sm:$0xff] }
 0x1cc   :  { %1442 = vmatmul.mubr.msk.f32.gmra.mrb[8].mxu0 %vm405_vm11, %v364_v50  ;;  %1446 = vmatmul.mubr.msk.f32.gmra.mrb[4].mxu1 %vm405_vm11, %v364_v50  ;;  %v808_v50 = vld [vmem:[%s2787_s5 + $0x1f0] sm:$0xff]  ;;  %v1682_v56 = vpack.c.bf16 %v761_v54, %v760_v53  ;;  %v793_v17 = vld [vmem:[%s2787_s5 + $0x178] sm:$0xff] }
 0x1cd   :  { %500 = vmatprep.mubr.f32.mxu0 %v1891_v30  ;;  %589 = vmatprep.mubr.f32.mxu1 %v1891_v30  ;;  %v1712_v55 = vpack.c.bf16 %v809_v52, %v808_v50 }
 0x1ce   :  { %1663 = vmatpush3.bf16.msra.mxu0 %v1662_v57  ;;  %1695 = vmatpush3.bf16.msra.mxu1 %v1694_v60  ;;  %v1714_v57 = vpack.c.bf16 %v793_v17, %v792_v16  ;;  %v600_v60 = vsub.s32 0, %v2470_v59 }
 0x1cf   :  { %1665 = vmatprep.subr.bf16.mxu0 %v1664_v3  ;;  %1697 = vmatprep.subr.bf16.mxu1 %v1696_v10  ;;  %v612_v3 = vsub.s32 3, %v2470_v59 }
 0x1d0   :  { %1443 = vmatmul.mubr.msk.f32.gmra.mrb[10].mxu0 %vm405_vm11, %v1584_v47  ;;  %1447 = vmatmul.mubr.msk.f32.gmra.mrb[6].mxu1 %vm405_vm11, %v1584_v47  ;;  %v1710_v47 = vpack.c.bf16 %v791_v46, %v790_v8  ;;  %v2481_v4 = vrot.slane %v596_v62, %v600_v60 }
 0x1d1   :  { %v2489_v10 = vrot.slane %v596_v62, %v612_v3 }
 0x1d2   :  { %1667 = vmatpush3.bf16.msra.mxu0 %v1666_v13  ;;  %1699 = vmatpush3.bf16.msra.mxu1 %v1698_v15 }
 0x1d3   :  { %1669 = vmatprep.subr.bf16.mxu0 %v1668_v20  ;;  %1701 = vmatprep.subr.bf16.mxu1 %v1700_v25 }
 0x1d6   :  { %1671 = vmatpush3.bf16.msra.mxu0 %v1670_v26  ;;  %1703 = vmatpush3.bf16.msra.mxu1 %v1702_v11 }
 0x1d7   :  { %1673 = vmatprep.subr.bf16.mxu0 %v1672_v34  ;;  %1705 = vmatprep.subr.bf16.mxu1 %v1704_v6 }
 0x1da   :  { %1675 = vmatpush3.bf16.msra.mxu0 %v1674_v36  ;;  %1707 = vmatpush3.bf16.msra.mxu1 %v1706_v38 }
 0x1db   :  { %1677 = vmatprep.subr.bf16.mxu0 %v1676_v41  ;;  %1709 = vmatprep.subr.bf16.mxu1 %v1708_v9 }
 0x1de   :  { %1679 = vmatpush3.bf16.msra.mxu0 %v1678_v45  ;;  %1711 = vmatpush3.bf16.msra.mxu1 %v1710_v47 }
 0x1df   :  { %1681 = vmatprep.subr.bf16.mxu0 %v1680_v51  ;;  %1713 = vmatprep.subr.bf16.mxu1 %v1712_v55 }
 0x1e2   :  { %1683 = vmatpush3.bf16.msra.mxu0 %v1682_v56  ;;  %1715 = vmatpush3.bf16.msra.mxu1 %v1714_v57 }
 0x297   :  { %v484_v13 = vpop.f32.mrb[4].mxu0  ;;  %v573_v14 = vpop.f32.mrb[0].mxu1 }
 0x298   :  { %v618_v23 = vsub.f32 %v484_v13, %v2481_v4  ;;  %v620_v15 = vsub.f32 %v573_v14, %v2483_v5  ;;  %v486_v18 = vpop.f32.mrb[5].mxu0  ;;  %v575_v19 = vpop.f32.mrb[1].mxu1 }
 0x299   :  { %v619_v28 = vsub.f32 %v486_v18, %v2487_v7  ;;  %v621_v20 = vsub.f32 %v575_v19, %v2489_v10 }
 0x29a   :  { %v634_v21 = vmul.f32 %v618_v23, %v618_v23  ;;  %v636_v24 = vmul.f32 %v620_v15, %v620_v15 }
 0x29b   :  { %v635_v29 = vmul.f32 %v619_v28, %v619_v28  ;;  %v637_v25 = vmul.f32 %v621_v20, %v621_v20  ;;  %v490_v26 = vpop.f32.mrb[6].mxu0  ;;  %v579_v27 = vpop.f32.mrb[2].mxu1 }
 0x29c   :  { %v650_v12 = vsub.f32 0.0, %v634_v21  ;;  %v652_v11 = vsub.f32 0.0, %v636_v24  ;;  %v622_v31 = vsub.f32 %v490_v26, %v2481_v4  ;;  %v624_v32 = vsub.f32 %v579_v27, %v2483_v5  ;;  %v492_v33 = vpop.f32.mrb[7].mxu0  ;;  %v581_v34 = vpop.f32.mrb[3].mxu1 }
 0x29d   :  { %v651_v35 = vsub.f32 0.0, %v635_v29  ;;  %v653_v1 = vsub.f32 0.0, %v637_v25  ;;  %v623_v2 = vsub.f32 %v492_v33, %v2487_v7  ;;  %v625_v6 = vsub.f32 %v581_v34, %v2489_v10 }
 0x29e   :  { %v666_v36 = vmul.f32 50.0, %v650_v12  ;;  %v668_v0 = vmul.f32 50.0, %v652_v11  ;;  %v638_v37 = vmul.f32 %v622_v31, %v622_v31  ;;  %v640_v38 = vmul.f32 %v624_v32, %v624_v32 }
 0x29f   :  { %v667_v39 = vmul.f32 50.0, %v651_v35  ;;  %v669_v22 = vmul.f32 50.0, %v653_v1  ;;  %v639_v40 = vmul.f32 %v623_v2, %v623_v2  ;;  %v641_v41 = vmul.f32 %v625_v6, %v625_v6  ;;  %v496_v42 = vpop.f32.mrb[8].mxu0  ;;  %v585_v43 = vpop.f32.mrb[4].mxu1 }
 0x2a0   :  { %v682_v44 = vmul.f32 1.442695, %v666_v36  ;;  %v686_v9 = vmul.f32 1.442695, %v668_v0  ;;  %v654_v45 = vsub.f32 0.0, %v638_v37  ;;  %v656_v8 = vsub.f32 0.0, %v640_v38 }
 0x2a1   :  { %v684_v46 = vmul.f32 1.442695, %v667_v39  ;;  %v688_v47 = vmul.f32 1.442695, %v669_v22  ;;  %v655_v48 = vsub.f32 0.0, %v639_v40  ;;  %v657_v49 = vsub.f32 0.0, %v641_v41 }
 0x2a2   :  { %1828 = vpow2.f32 %v682_v44  ;;  %v670_v50 = vmul.f32 50.0, %v654_v45  ;;  %v672_v51 = vmul.f32 50.0, %v656_v8  ;;  %v626_v52 = vsub.f32 %v496_v42, %v2481_v4  ;;  %v498_v53 = vpop.f32.mrb[9].mxu0  ;;  %v587_v54 = vpop.f32.mrb[5].mxu1  ;;  %v715_v37 = vld [vmem:[%s2786_s4 + $0x8] sm:$0xff] }
 0x2a3   :  { %1830 = vpow2.f32 %v686_v9  ;;  %v671_v55 = vmul.f32 50.0, %v655_v48  ;;  %v673_v56 = vmul.f32 50.0, %v657_v49  ;;  %v628_v16 = vsub.f32 %v585_v43, %v2483_v5  ;;  %v502_v17 = vpop.f32.mrb[10].mxu0  ;;  %v591_v57 = vpop.f32.mrb[6].mxu1  ;;  %v716_v9 = vld [vmem:[%s2786_s4 + $0x10] sm:$0xff] }
 0x2a4   :  { %1832 = vpow2.f32 %v684_v46  ;;  %v690_v58 = vmul.f32 1.442695, %v670_v50  ;;  %v694_v61 = vmul.f32 1.442695, %v672_v51  ;;  %v642_v62 = vmul.f32 %v626_v52, %v626_v52  ;;  %v504_v3 = vpop.f32.mrb[11].mxu0  ;;  %v593_v13 = vpop.f32.mrb[7].mxu1 }
 0x2a5   :  { %1834 = vpow2.f32 %v688_v47  ;;  %v692_v14 = vmul.f32 1.442695, %v671_v55  ;;  %v696_v23 = vmul.f32 1.442695, %v673_v56  ;;  %v644_v15 = vmul.f32 %v628_v16, %v628_v16  ;;  %v721_v16 = vld [vmem:[%s2786_s4 + $0x38] sm:$0xff] }
 0x2a6   :  { %1836 = vpow2.f32 %v690_v58  ;;  %v658_v18 = vsub.f32 0.0, %v642_v62  ;;  %v627_v19 = vsub.f32 %v498_v53, %v2487_v7  ;;  %v629_v28 = vsub.f32 %v587_v54, %v2489_v10  ;;  %v719_v53 = vld [vmem:[%s2786_s4 + $0x28] sm:$0xff] }
 0x2a7   :  { %1838 = vpow2.f32 %v694_v61  ;;  %v660_v20 = vsub.f32 0.0, %v644_v15  ;;  %v630_v21 = vsub.f32 %v502_v17, %v2481_v4  ;;  %v632_v24 = vsub.f32 %v591_v57, %v2483_v5  ;;  %v718_v17 = vld [vmem:[%s2786_s4 + $0x20] sm:$0xff]  ;;  %v720_v61 = vld [vmem:[%s2786_s4 + $0x30] sm:$0xff] }
 0x2a8   :  { %1840 = vpow2.f32 %v692_v14  ;;  %v674_v29 = vmul.f32 50.0, %v658_v18  ;;  %v643_v25 = vmul.f32 %v627_v19, %v627_v19  ;;  %v645_v26 = vmul.f32 %v629_v28, %v629_v28  ;;  %v723_v28 = vld [vmem:[%s2786_s4 + $0x48] sm:$0xff] }
 0x2a9   :  { %1842 = vpow2.f32 %v696_v23  ;;  %v676_v27 = vmul.f32 50.0, %v660_v20  ;;  %v646_v12 = vmul.f32 %v630_v21, %v630_v21  ;;  %v648_v11 = vmul.f32 %v632_v24, %v632_v24  ;;  %v725_v20 = vld [vmem:[%s2786_s4 + $0x58] sm:$0xff]  ;;  %v722_v21 = vld [vmem:[%s2786_s4 + $0x40] sm:$0xff] }
 0x2aa   :  { %v698_v31 = vmul.f32 1.442695, %v674_v29  ;;  %v659_v32 = vsub.f32 0.0, %v643_v25  ;;  %v661_v33 = vsub.f32 0.0, %v645_v26  ;;  %v631_v34 = vsub.f32 %v504_v3, %v2487_v7  ;;  %v717_v7 = vld [vmem:[%s2786_s4 + $0x18] sm:$0xff]  ;;  %v724_v29 = vld [vmem:[%s2786_s4 + $0x50] sm:$0xff] }
 0x2ab   :  { %v702_v35 = vmul.f32 1.442695, %v676_v27  ;;  %v662_v1 = vsub.f32 0.0, %v646_v12  ;;  %v664_v2 = vsub.f32 0.0, %v648_v11  ;;  %v633_v4 = vsub.f32 %v593_v13, %v2489_v10  ;;  %v714_v10 = vld [vmem:[%s2786_s4] sm:$0xff] }
 0x2ac   :  { %v1829_v6 = vpop.eup %1828  ;;  %v675_v5 = vmul.f32 50.0, %v659_v32  ;;  %v677_v36 = vmul.f32 50.0, %v661_v33  ;;  %v647_v0 = vmul.f32 %v631_v34, %v631_v34  ;;  %1844 = vpow2.f32 %v698_v31  ;;  %v727_v31 = vld [vmem:[%s2786_s4 + $0x68] sm:$0xff]  ;;  %v729_v34 = vld [vmem:[%s2786_s4 + $0x78] sm:$0xff] }
 0x2ad   :  { %v1831_v38 = vpop.eup %1830  ;;  %v678_v39 = vmul.f32 50.0, %v662_v1  ;;  %v680_v22 = vmul.f32 50.0, %v664_v2  ;;  %v649_v40 = vmul.f32 %v633_v4, %v633_v4  ;;  %1846 = vpow2.f32 %v702_v35  ;;  %v726_v35 = vld [vmem:[%s2786_s4 + $0x60] sm:$0xff]  ;;  %v728_v2 = vld [vmem:[%s2786_s4 + $0x70] sm:$0xff] }
 0x2ae   :  { %v1833_v41 = vpop.eup %1832  ;;  %v700_v42 = vmul.f32 1.442695, %v675_v5  ;;  %v704_v43 = vmul.f32 1.442695, %v677_v36  ;;  %v663_v44 = vsub.f32 0.0, %v647_v0  ;;  %v730_v52 = vmul.f32 %v1829_v6, %v714_v10  ;;  %v993_v10 = vld [vmem:[%s2788_s6 + $0x28] sm:$0xff] }
 0x2af   :  { %v1835_v45 = vpop.eup %1834  ;;  %v706_v8 = vmul.f32 1.442695, %v678_v39  ;;  %v710_v46 = vmul.f32 1.442695, %v680_v22  ;;  %v665_v47 = vsub.f32 0.0, %v649_v40  ;;  %v731_v48 = vmul.f32 %v1833_v41, %v715_v37  ;;  %v989_v37 = vld [vmem:[%s2788_s6 + $0x8] sm:$0xff] }
 0x2b0   :  { %v1837_v49 = vpop.eup %1836  ;;  %1848 = vpow2.f32 %v700_v42  ;;  %v679_v50 = vmul.f32 50.0, %v663_v44  ;;  %v733_v51 = vmul.f32 %v1835_v45, %v717_v7  ;;  %v732_v56 = vmul.f32 %v1831_v38, %v716_v9  ;;  %v991_v38 = vld [vmem:[%s2788_s6 + $0x18] sm:$0xff]  ;;  %v988_v22 = vld [vmem:[%s2788_s6] sm:$0xff]  ;;  %v990_v40 = vld [vmem:[%s2788_s6 + $0x10] sm:$0xff] }
 0x2b1   :  { %v1839_v54 = vpop.eup %1838  ;;  %1850 = vpow2.f32 %v704_v43  ;;  %v681_v55 = vmul.f32 50.0, %v665_v47  ;;  %874 = vmatprep.mubr.f32.mxu0 %v731_v48  ;;  %v734_v23 = vmul.f32 %v1837_v49, %v718_v17  ;;  %v1716_v39 = vpack.c.bf16 %v991_v38, %v989_v37  ;;  %v995_v41 = vld [vmem:[%s2788_s6 + $0x38] sm:$0xff]  ;;  %v992_v43 = vld [vmem:[%s2788_s6 + $0x20] sm:$0xff]  ;;  %v994_v44 = vld [vmem:[%s2788_s6 + $0x30] sm:$0xff] }
 0x2b2   :  { %v1841_v57 = vpop.eup %1840  ;;  %1852 = vpow2.f32 %v706_v8  ;;  %v708_v58 = vmul.f32 1.442695, %v679_v50  ;;  %959 = vmatprep.mubr.f32.mxu1 %v733_v51  ;;  %875 = vmatmul.mubr.f32.vlgmr.msra.gmra.mrb[12].mxu0 %v730_v52  ;;  %v736_v15 = vmul.f32 %v1839_v54, %v720_v61  ;;  %v1718_v7 = vpack.c.bf16 %v990_v40, %v988_v22  ;;  %v997_v45 = vld [vmem:[%s2788_s6 + $0x48] sm:$0xff]  ;;  %v999_v8 = vld [vmem:[%s2788_s6 + $0x58] sm:$0xff]  ;;  %v996_v47 = vld [vmem:[%s2788_s6 + $0x40] sm:$0xff] }
 0x2b3   :  { %v1843_v62 = vpop.eup %1842  ;;  %1854 = vpow2.f32 %v710_v46  ;;  %v712_v3 = vmul.f32 1.442695, %v681_v55  ;;  %960 = vmatmul.mubr.f32.vlgmr.msra.gmra.mrb[8].mxu1 %v732_v56  ;;  %v735_v13 = vmul.f32 %v1841_v57, %v719_v53  ;;  %1717 = vmatprep.subr.bf16.mxu0 %v1716_v39  ;;  %v1720_v42 = vpack.c.bf16 %v995_v41, %v993_v10  ;;  %v998_v48 = vld [vmem:[%s2788_s6 + $0x50] sm:$0xff]  ;;  %v1001_v50 = vld [vmem:[%s2788_s6 + $0x68] sm:$0xff]  ;;  %v1000_v51 = vld [vmem:[%s2788_s6 + $0x60] sm:$0xff] }
 0x2b4   :  { %1856 = vpow2.f32 %v708_v58  ;;  %v737_v14 = vmul.f32 %v1843_v62, %v721_v16  ;;  %1719 = vmatpush1.bf16.msra.mxu0 %v1718_v7  ;;  %v1722_v9 = vpack.c.bf16 %v994_v44, %v992_v43  ;;  %v1724_v46 = vpack.c.bf16 %v999_v8, %v997_v45  ;;  %v1124_v52 = vld [vmem:[%s2790_s8] sm:$0xff]  ;;  %v1125_v53 = vld [vmem:[%s2790_s8 + $0x8] sm:$0xff]  ;;  %v1126_v54 = vld [vmem:[%s2790_s8 + $0x10] sm:$0xff] }
 0x2b5   :  { %1858 = vpow2.f32 %v712_v3  ;;  %879 = vmatprep.mubr.f32.mxu0 %v735_v13  ;;  %1721 = vmatprep.subr.bf16.mxu0 %v1720_v42  ;;  %v1726_v49 = vpack.c.bf16 %v998_v48, %v996_v47  ;;  %v1892_v55 = vmov 0.0|0.0   ;;  %v1729_v56 = vpack.c.bf16 %v1125_v53, %v1124_v52  ;;  %v1127_v16 = vld [vmem:[%s2790_s8 + $0x18] sm:$0xff]  ;;  %v1128_v57 = vld [vmem:[%s2790_s8 + $0x20] sm:$0xff]  ;;  %v1129_v58 = vld [vmem:[%s2790_s8 + $0x28] sm:$0xff] }
 0x2b6   :  { %964 = vmatprep.mubr.f32.mxu1 %v737_v14  ;;  %880 = vmatmul.mubr.f32.gmra.mrb[14].mxu0 %v734_v23  ;;  %v1845_v18 = vpop.eup %1844  ;;  %v1732_v17 = vpack.c.bf16 %v1127_v16, %v1126_v54  ;;  %v1735_v61 = vpack.c.bf16 %v1129_v58, %v1128_v57  ;;  %v1130_v62 = vld [vmem:[%s2790_s8 + $0x30] sm:$0xff]  ;;  %v1131_v3 = vld [vmem:[%s2790_s8 + $0x38] sm:$0xff]  ;;  %v1132_v14 = vld [vmem:[%s2790_s8 + $0x40] sm:$0xff] }
 0x2b7   :  { %965 = vmatmul.mubr.f32.gmra.mrb[10].mxu1 %v736_v15  ;;  %v1847_v19 = vpop.eup %1846  ;;  %v738_v11 = vmul.f32 %v1845_v18, %v722_v21  ;;  %1728 = vmatprep.subr.bf16.mxu1 %v1892_v55  ;;  %v1738_v13 = vpack.c.bf16 %v1131_v3, %v1130_v62  ;;  %v1133_v23 = vld [vmem:[%s2790_s8 + $0x48] sm:$0xff]  ;;  %v1134_v18 = vld [vmem:[%s2790_s8 + $0x50] sm:$0xff] }
 0x2b8   :  { %v740_v33 = vmul.f32 %v1847_v19, %v724_v29  ;;  %1723 = vmatpush1.bf16.msra.mxu0 %v1722_v9  ;;  %1730 = vmatpush1.bf16.msra.mxu1 %v1729_v56  ;;  %v1741_v15 = vpack.c.bf16 %v1133_v23, %v1132_v14  ;;  %v1135_v19 = vld [vmem:[%s2790_s8 + $0x58] sm:$0xff]  ;;  %v1137_v21 = vld [vmem:[%s2790_s8 + $0x68] sm:$0xff]  ;;  %v1138_v29 = vld [vmem:[%s2790_s8 + $0x70] sm:$0xff] }
 0x2b9   :  { %1725 = vmatprep.subr.bf16.mxu0 %v1724_v46  ;;  %1731 = vmatprep.subr.bf16.mxu1 %v1892_v55 }
 0x2ba   :  { %v1849_v24 = vpop.eup %1848 }
 0x2bb   :  { %v1851_v25 = vpop.eup %1850  ;;  %v739_v26 = vmul.f32 %v1849_v24, %v723_v28  ;;  %v1744_v28 = vpack.c.bf16 %v1135_v19, %v1134_v18 }
 0x2bc   :  { %v1853_v27 = vpop.eup %1852  ;;  %v741_v12 = vmul.f32 %v1851_v25, %v725_v20  ;;  %1727 = vmatpush1.bf16.msra.mxu0 %v1726_v49  ;;  %1733 = vmatpush1.bf16.msra.mxu1 %v1732_v17  ;;  %v1136_v20 = vld [vmem:[%s2790_s8 + $0x60] sm:$0xff]  ;;  %v1139_v25 = vld [vmem:[%s2790_s8 + $0x78] sm:$0xff] }
 0x2bd   :  { %v1855_v32 = vpop.eup %1854  ;;  %884 = vmatprep.mubr.f32.mxu0 %v739_v26  ;;  %v742_v36 = vmul.f32 %v1853_v27, %v726_v35  ;;  %1039 = vmatprep.subr.mxu0 %v1001_v50  ;;  %v1747_v24 = vpack.c.bf16 %v1137_v21, %v1136_v20  ;;  %v1750_v26 = vpack.c.bf16 %v1139_v25, %v1138_v29  ;;  %v1140_v27 = vld [vmem:[%s2790_s8 + $0x80] sm:$0xff]  ;;  %v1145_v35 = vld [vmem:[%s2790_s8 + $0xa8] sm:$0xff]  ;;  %v1151_v29 = vld [vmem:[%s2790_s8 + $0xd8] sm:$0xff] }
 0x2be   :  { %v1857_v1 = vpop.eup %1856  ;;  %969 = vmatprep.mubr.f32.mxu1 %v741_v12  ;;  %885 = vmatmul.mubr.f32.gmra.mrb[16].mxu0 %v738_v11  ;;  %v744_v0 = vmul.f32 %v1855_v32, %v728_v2  ;;  %v1141_v12 = vld [vmem:[%s2790_s8 + $0x88] sm:$0xff]  ;;  %v1143_v32 = vld [vmem:[%s2790_s8 + $0x98] sm:$0xff]  ;;  %v1146_v2 = vld [vmem:[%s2790_s8 + $0xb0] sm:$0xff] }
 0x2bf   :  { %v1859_v4 = vpop.eup %1858  ;;  %970 = vmatmul.mubr.f32.gmra.mrb[12].mxu1 %v740_v33  ;;  %v743_v6 = vmul.f32 %v1857_v1, %v727_v31  ;;  %1734 = vmatprep.subr.bf16.mxu1 %v1892_v55  ;;  %v1753_v11 = vpack.c.bf16 %v1141_v12, %v1140_v27  ;;  %v1142_v31 = vld [vmem:[%s2790_s8 + $0x90] sm:$0xff]  ;;  %v1149_v20 = vld [vmem:[%s2790_s8 + $0xc8] sm:$0xff] }
 0x2c0   :  { %v745_v5 = vmul.f32 %v1859_v4, %v729_v34  ;;  %1040 = vmatpush1.msra.mxu0 %v1000_v51  ;;  %1736 = vmatpush1.bf16.msra.mxu1 %v1735_v61  ;;  %v1756_v33 = vpack.c.bf16 %v1143_v32, %v1142_v31  ;;  %v1144_v34 = vld [vmem:[%s2790_s8 + $0xa0] sm:$0xff]  ;;  %v1147_v4 = vld [vmem:[%s2790_s8 + $0xb8] sm:$0xff] }
 0x2c1   :  { %889 = vmatprep.mubr.f32.mxu0 %v743_v6  ;;  %1770 = vmatprep.subr.bf16.mxu0 %v1892_v55  ;;  %v1759_v1 = vpack.c.bf16 %v1145_v35, %v1144_v34  ;;  %v1762_v6 = vpack.c.bf16 %v1147_v4, %v1146_v2 }
 0x2c2   :  { %974 = vmatprep.mubr.f32.mxu1 %v745_v5  ;;  %890 = vmatmul.mubr.f32.gmra.mrb[18].mxu0 %v742_v36 }
 0x2c3   :  { %975 = vmatmul.mubr.f32.gmra.mrb[14].mxu1 %v744_v0  ;;  %1091 = vmatprep.mubr.f32.mxu0 %v1891_v30 }
 0x2c4   :  { %1737 = vmatprep.subr.bf16.mxu1 %v1892_v55 }
 0x2c5   :  { %1739 = vmatpush1.bf16.msra.mxu1 %v1738_v13 }
 0x2c6   :  { %1740 = vmatprep.subr.bf16.mxu1 %v1892_v55 }
 0x2c9   :  { %1742 = vmatpush1.bf16.msra.mxu1 %v1741_v15 }
 0x2ca   :  { %1743 = vmatprep.subr.bf16.mxu1 %v1892_v55 }
 0x2cd   :  { %1745 = vmatpush1.bf16.msra.mxu1 %v1744_v28  ;;  %v1148_v28 = vld [vmem:[%s2790_s8 + $0xc0] sm:$0xff] }
 0x2ce   :  { %1746 = vmatprep.subr.bf16.mxu1 %v1892_v55  ;;  %v1765_v21 = vpack.c.bf16 %v1149_v20, %v1148_v28 }
 0x2d1   :  { %1748 = vmatpush1.bf16.msra.mxu1 %v1747_v24  ;;  %v1150_v24 = vld [vmem:[%s2790_s8 + $0xd0] sm:$0xff] }
 0x2d2   :  { %1749 = vmatprep.subr.bf16.mxu1 %v1892_v55  ;;  %v1768_v25 = vpack.c.bf16 %v1151_v29, %v1150_v24  ;;  %v1284_v24 = vld [vmem:[%s2795_s13 + $0x18] sm:$0xff] }
 0x2d5   :  { %1751 = vmatpush1.bf16.msra.mxu1 %v1750_v26  ;;  %v1002_v26 = vld [vmem:[%s2789_s7] sm:$0x3] }
 0x2d6   :  { %1752 = vmatprep.subr.bf16.mxu1 %v1892_v55  ;;  %v1007_v27 = vrot.slane %v1002_v26, %v600_v60  ;;  %v1011_v12 = vrot.slane %v1002_v26, %v604_v63 }
 0x2d9   :  { %1754 = vmatpush1.bf16.msra.mxu1 %v1753_v11 }
 0x2da   :  { %1755 = vmatprep.subr.bf16.mxu1 %v1892_v55 }
 0x2dd   :  { %1757 = vmatpush1.bf16.msra.mxu1 %v1756_v33 }
 0x2de   :  { %1758 = vmatprep.subr.bf16.mxu1 %v1892_v55 }
 0x2e1   :  { %1760 = vmatpush1.bf16.msra.mxu1 %v1759_v1 }
 0x2e2   :  { %1761 = vmatprep.subr.bf16.mxu1 %v1892_v55 }
 0x2e5   :  { %1763 = vmatpush1.bf16.msra.mxu1 %v1762_v6 }
 0x2e6   :  { %1764 = vmatprep.subr.bf16.mxu1 %v1892_v55 }
 0x2e9   :  { %1766 = vmatpush1.bf16.msra.mxu1 %v1765_v21  ;;  %v1275_v21 = vld [vmem:[%s2794_s12 + $0x10] sm:$0xff] }
 0x2ea   :  { %1767 = vmatprep.subr.bf16.mxu1 %v1892_v55  ;;  %v1279_v29 = vmul.f32 1000000.0, %v1275_v21 }
 0x2ed   :  { %1769 = vmatpush1.bf16.msra.mxu1 %v1768_v25 }
 0x385   :  { %v1502_v5 = vpop.f32.mrb[12].mxu0 }
 0x386   :  { %v1546_v36 = vpop.f32.mrb[8].mxu1  ;;  %v1503_v0 = vpop.f32.mrb[13].mxu0 }
 0x387   :  { %v1504_v37 = vadd.f32 %v1503_v0, %v1502_v5  ;;  %v1547_v38 = vpop.f32.mrb[9].mxu1 }
 0x388   :  { %v1548_v39 = vadd.f32 %v1547_v38, %v1546_v36 }
 0x389   :  { %v877_v22 = vadd.f32 1e-06, %v1504_v37  ;;  %v1505_v40 = vpop.f32.mrb[14].mxu0 }
 0x38a   :  { %v1549_v7 = vpop.f32.mrb[10].mxu1  ;;  %v1506_v10 = vpop.f32.mrb[15].mxu0 }
 0x38b   :  { %v962_v41 = vadd.f32 %v1548_v39, %v877_v22  ;;  %v1507_v42 = vadd.f32 %v1506_v10, %v1505_v40  ;;  %v1550_v43 = vpop.f32.mrb[11].mxu1 }
 0x38c   :  { %v1551_v44 = vadd.f32 %v1550_v43, %v1549_v7 }
 0x38d   :  { %1860 = vlog2.f32 %v962_v41  ;;  %v882_v9 = vadd.f32 1e-06, %v1507_v42  ;;  %v1153_v42 = vstv %s2798_s16 }
 0x38f   :  { %v967_v45 = vadd.f32 %v1551_v44, %v882_v9 }
 0x391   :  { %1862 = vlog2.f32 %v967_v45  ;;  %v1508_v8 = vpop.f32.mrb[16].mxu0 }
 0x392   :  { %v1552_v46 = vpop.f32.mrb[12].mxu1  ;;  %v1509_v47 = vpop.f32.mrb[17].mxu0 }
 0x393   :  { %v1510_v48 = vadd.f32 %v1509_v47, %v1508_v8  ;;  %v1553_v49 = vpop.f32.mrb[13].mxu1 }
 0x394   :  { %v1554_v50 = vadd.f32 %v1553_v49, %v1552_v46 }
 0x395   :  { %v887_v51 = vadd.f32 1e-06, %v1510_v48  ;;  %v1511_v52 = vpop.f32.mrb[18].mxu0 }
 0x396   :  { %v1555_v53 = vpop.f32.mrb[14].mxu1  ;;  %v1512_v54 = vpop.f32.mrb[19].mxu0 }
 0x397   :  { %v1861_v56 = vpop.eup %1860  ;;  %v972_v16 = vadd.f32 %v1554_v50, %v887_v51  ;;  %v1513_v17 = vadd.f32 %v1512_v54, %v1511_v52  ;;  %v1556_v57 = vpop.f32.mrb[15].mxu1 }
 0x398   :  { %v981_v58 = vmul.f32 0.6931472, %v1861_v56  ;;  %v1557_v61 = vadd.f32 %v1556_v57, %v1555_v53 }
 0x399   :  { %1864 = vlog2.f32 %v972_v16  ;;  %v892_v62 = vadd.f32 1e-06, %v1513_v17  ;;  %v1281_v17 = vld [vmem:[%s2795_s13] sm:$0xff] }
 0x39a   :  { %1448 = vmatmul.mubr.msk.f32.vlgmr.msra.gmra.mrb[20].mxu0 %vm1014_vm12, %v981_v58  ;;  %v1285_v57 = vmul.f32 1000000.0, %v1281_v17  ;;  %v1273_v58 = vld [vmem:[%s2794_s12] sm:$0xff] }
 0x39b   :  { %v1863_v3 = vpop.eup %1862  ;;  %v977_v13 = vadd.f32 %v1557_v61, %v892_v62  ;;  %1097 = vmatprep.mubr.f32.mxu0 %v1891_v30  ;;  %v1282_v61 = vld [vmem:[%s2795_s13 + $0x8] sm:$0xff]  ;;  %v1277_v62 = vmul.f32 1000000.0, %v1273_v58 }
 0x39c   :  { %v983_v14 = vmul.f32 0.6931472, %v1863_v3  ;;  %v1289_v3 = vmax.f32 %v1285_v57, 0.0  ;;  %v1255_v57 = vld [vmem:[%s2792_s10 + $0x18] sm:$0xff] }
 0x39d   :  { %1866 = vlog2.f32 %v977_v13  ;;  %v1286_v13 = vmul.f32 1000000.0, %v1282_v61 }
 0x39e   :  { %1449 = vmatmul.mubr.msk.f32.gmra.mrb[22].mxu0 %vm1014_vm12, %v983_v14  ;;  %v1293_v14 = vadd.f32 %v1289_v3, %v1277_v62 }
 0x39f   :  { %1103 = vmatprep.mubr.f32.mxu0 %v1891_v30 }
 0x3a0   :  { %v1297_v28 = vadd.f32 1e-06, %v1293_v14 }
 0x3a2   :  { %1868 = vrcp.f32 %v1297_v28 }
 0x3a3   :  { %v1865_v23 = vpop.eup %1864 }
 0x3a4   :  { %v985_v15 = vmul.f32 0.6931472, %v1865_v23 }
 0x3a6   :  { %1450 = vmatmul.mubr.msk.f32.gmra.mrb[24].mxu0 %vm1014_vm12, %v985_v15  ;;  %v1290_v15 = vmax.f32 %v1286_v13, 0.0 }
 0x3a7   :  { %v1867_v18 = vpop.eup %1866  ;;  %1109 = vmatprep.mubr.f32.mxu0 %v1891_v30 }
 0x3a8   :  { %v987_v19 = vmul.f32 0.6931472, %v1867_v18  ;;  %v1283_v18 = vld [vmem:[%s2795_s13 + $0x10] sm:$0xff] }
 0x3aa   :  { %1451 = vmatmul.mubr.msk.f32.gmra.mrb[26].mxu0 %vm1014_vm12, %v987_v19  ;;  %v1287_v19 = vmul.f32 1000000.0, %v1283_v18 }
 0x3ab   :  { %1593 = vmatprep.mubr.msk.f32.mxu0 %vm1893_vm15, %v1891_v30  ;;  %v1274_v30 = vld [vmem:[%s2794_s12 + $0x8] sm:$0xff] }
 0x3ac   :  { %v1278_v23 = vmul.f32 1000000.0, %v1274_v30  ;;  %v1291_v25 = vmax.f32 %v1287_v19, 0.0 }
 0x3ae   :  { %v1294_v20 = vadd.f32 %v1290_v15, %v1278_v23 }
 0x3b0   :  { %v1298_v26 = vadd.f32 1e-06, %v1294_v20 }
 0x3b2   :  { %1870 = vrcp.f32 %v1298_v26 }
 0x46d   :  { %v1093_v11 = vpop.f32.mrb[20].mxu0 }
 0x46e   :  { %v1094_v31 = vadd.f32 %v1093_v11, %v1007_v27  ;;  %v1095_v32 = vpop.f32.mrb[21].mxu0  ;;  %v1295_v11 = vadd.f32 %v1291_v25, %v1279_v29 }
 0x46f   :  { %v1096_v33 = vadd.f32 %v1095_v32, %v1011_v12 }
 0x470   :  { %v1116_v1 = vmax.f32 %v1094_v31, 0.0 }
 0x471   :  { %v1117_v34 = vmax.f32 %v1096_v33, 0.0  ;;  %v1099_v35 = vpop.f32.mrb[22].mxu0  ;;  %v1299_v33 = vadd.f32 1e-06, %v1295_v11  ;;  %v1347_v11 = vld [vmem:[%s2791_s9] sm:$0xf] }
 0x472   :  { %v1100_v2 = vadd.f32 %v1099_v35, %v1007_v27  ;;  %v1101_v4 = vpop.f32.mrb[23].mxu0  ;;  %v1869_v35 = vpop.eup %1868 }
 0x473   :  { %v1102_v6 = vadd.f32 %v1101_v4, %v1011_v12  ;;  %1452 = vmatprep.mubr.msk.f32.mxu1 %vm1154_vm13, %v1117_v34  ;;  %1872 = vrcp.f32 %v1299_v33  ;;  %v1871_v4 = vpop.eup %1870 }
 0x474   :  { %1232 = vmatmul.mubr.f32.vlgmr.msra.gmra.mrb[16].mxu1 %v1116_v1  ;;  %v1118_v36 = vmax.f32 %v1100_v2, 0.0  ;;  %v1302_v2 = vmul.f32 %v1869_v35, %v1277_v62 }
 0x475   :  { %v1119_v5 = vmax.f32 %v1102_v6, 0.0  ;;  %v1309_v6 = vld [vmem:[%s2793_s11] sm:$0xff] }
 0x477   :  { %1453 = vmatprep.mubr.msk.f32.mxu1 %vm1154_vm13, %v1119_v5  ;;  %v1313_v5 = vmul.f32 %v1309_v6, %v1302_v2 }
 0x478   :  { %1237 = vmatmul.mubr.f32.gmra.mrb[18].mxu1 %v1118_v36  ;;  %v1304_v36 = vmul.f32 %v1871_v4, %v1278_v23 }
 0x479   :  { %v1105_v59 = vpop.f32.mrb[24].mxu0 }
 0x47a   :  { %v1106_v60 = vadd.f32 %v1105_v59, %v1007_v27  ;;  %v1107_v63 = vpop.f32.mrb[25].mxu0  ;;  %v1252_v59 = vld [vmem:[%s2792_s10] sm:$0xff] }
 0x47b   :  { %v1108_v0 = vadd.f32 %v1107_v63, %v1011_v12 }
 0x47c   :  { %v1120_v39 = vmax.f32 %v1106_v60, 0.0  ;;  %v1310_v60 = vld [vmem:[%s2793_s11 + $0x8] sm:$0xff] }
 0x47d   :  { %v1121_v37 = vmax.f32 %v1108_v0, 0.0  ;;  %v1111_v38 = vpop.f32.mrb[26].mxu0  ;;  %v1873_v63 = vpop.eup %1872  ;;  %v1317_v0 = vmul.f32 %v1313_v5, %v1252_v59 }
 0x47e   :  { %v1112_v22 = vadd.f32 %v1111_v38, %v1007_v27  ;;  %v1113_v40 = vpop.f32.mrb[27].mxu0  ;;  %v1288_v27 = vmul.f32 1000000.0, %v1284_v24  ;;  %v1328_v38 = vstv %s1456_s26 }
 0x47f   :  { %v1114_v7 = vadd.f32 %v1113_v40, %v1011_v12  ;;  %1454 = vmatprep.mubr.msk.f32.mxu1 %vm1154_vm13, %v1121_v37  ;;  %v1276_v12 = vld [vmem:[%s2794_s12 + $0x18] sm:$0xff]  ;;  %v1314_v37 = vmul.f32 %v1310_v60, %v1304_v36 }
 0x480   :  { %1242 = vmatmul.mubr.f32.gmra.mrb[20].mxu1 %v1120_v39  ;;  %v1122_v41 = vmax.f32 %v1112_v22, 0.0  ;;  %v1280_v31 = vmul.f32 1000000.0, %v1276_v12  ;;  %v1292_v32 = vmax.f32 %v1288_v27, 0.0  ;;  %v1253_v39 = vld [vmem:[%s2792_s10 + $0x8] sm:$0xff]  ;;  %v1322_v22 = vstv %s1321_s27 }
 0x481   :  { %v1123_v10 = vmax.f32 %v1114_v7, 0.0  ;;  %v1306_v7 = vmul.f32 %v1873_v63, %v1279_v29 }
 0x482   :  { %v1296_v34 = vadd.f32 %v1292_v32, %v1280_v31 }
 0x483   :  { %1455 = vmatprep.mubr.msk.f32.mxu1 %vm1154_vm13, %v1123_v10  ;;  %v1329_v10 = vmul.f32 %v1328_v38, %v1317_v0 }
 0x484   :  { %1247 = vmatmul.mubr.f32.gmra.mrb[22].mxu1 %v1122_v41  ;;  %v1300_v1 = vadd.f32 1e-06, %v1296_v34 }
 0x486   :  { %1874 = vrcp.f32 %v1300_v1 }
 0x547   :  { %v1233_v43 = vpop.f32.mrb[16].mxu1 }
 0x548   :  { %v1234_v44 = vadd.f32 %v1233_v43, %v1153_v42  ;;  %v1235_v9 = vpop.f32.mrb[17].mxu1  ;;  %v1311_v43 = vld [vmem:[%s2793_s11 + $0x10] sm:$0xff] }
 0x54a   :  { %v1257_v45 = vsel %vm1256_vm14, %v1234_v44, -inf  ;;  %v1875_v44 = vpop.eup %1874 }
 0x54b   :  { %v1238_v8 = vpop.f32.mrb[18].mxu1  ;;  %1258 = vmax.xlane.f32.xlu0 %v1257_v45 }
 0x54c   :  { %v1239_v46 = vadd.f32 %v1238_v8, %v1153_v42  ;;  %v1240_v47 = vpop.f32.mrb[19].mxu1  ;;  %v1315_v8 = vmul.f32 %v1311_v43, %v1306_v7 }
 0x54e   :  { %v1260_v48 = vsel %vm1256_vm14, %v1239_v46, -inf }
 0x54f   :  { %1261 = vmax.xlane.f32.xlu1 %v1260_v48 }
 0x553   :  { %v1243_v49 = vpop.f32.mrb[20].mxu1 }
 0x554   :  { %v1244_v50 = vadd.f32 %v1243_v49, %v1153_v42  ;;  %v1245_v51 = vpop.f32.mrb[21].mxu1  ;;  %v1254_v49 = vld [vmem:[%s2792_s10 + $0x10] sm:$0xff] }
 0x555   :  { %v1338_v51 = vstv %s2797_s15 }
 0x556   :  { %v1263_v52 = vsel %vm1256_vm14, %v1244_v50, -inf  ;;  %v1308_v50 = vmul.f32 %v1875_v44, %v1280_v31 }
 0x557   :  { %1264 = vmax.xlane.f32.xlu0 %v1263_v52  ;;  %v1248_v53 = vpop.f32.mrb[22].mxu1  ;;  %v1312_v52 = vld [vmem:[%s2793_s11 + $0x18] sm:$0xff] }
 0x558   :  { %v1249_v54 = vadd.f32 %v1248_v53, %v1153_v42  ;;  %v1250_v56 = vpop.f32.mrb[23].mxu1  ;;  %v1318_v42 = vmul.f32 %v1314_v37, %v1253_v39  ;;  %v1316_v17 = vmul.f32 %v1312_v52, %v1308_v50 }
 0x55a   :  { %v1266_v16 = vsel %vm1256_vm14, %v1249_v54, -inf  ;;  %v1330_v47 = vmul.f32 %v1328_v38, %v1318_v42  ;;  %v1319_v54 = vmul.f32 %v1315_v8, %v1254_v49  ;;  %v1320_v14 = vmul.f32 %v1316_v17, %v1255_v57 }
 0x55b   :  { %1267 = vmax.xlane.f32.xlu1 %v1266_v16 }
 0x55c   :  { %v1331_v61 = vmul.f32 %v1328_v38, %v1319_v54  ;;  %v1332_v28 = vmul.f32 %v1328_v38, %v1320_v14 }
 0x5d8   :  { %v1259_v40 = vpop.xlane.xlu0 %1258 }
 0x5d9   :  { %v1269_v41 = vmul.f32 %v1259_v40, %v1252_v59 }
 0x5db   :  { %v1323_v9 = vmul.f32 %v1322_v22, %v1269_v41 }
 0x5dc   :  { %v1262_v45 = vpop.xlane.xlu1 %1261 }
 0x5dd   :  { %v1333_v46 = vadd.f32 %v1329_v10, %v1323_v9  ;;  %v1270_v48 = vmul.f32 %v1262_v45, %v1253_v39 }
 0x5df   :  { %v1324_v53 = vmul.f32 %v1322_v22, %v1270_v48  ;;  %v1339_v56 = vadd.f32 %v1338_v51, %v1333_v46 }
 0x5e1   :  { %v1334_v16 = vadd.f32 %v1330_v47, %v1324_v53  ;;  %v1343_v3 = vmul.f32 %v1339_v56, %v1252_v59 }
 0x5e3   :  { %v1340_v58 = vadd.f32 %v1338_v51, %v1334_v16 }
 0x5e4   :  { %v1265_v62 = vpop.xlane.xlu0 %1264 }
 0x5e5   :  { %v1344_v13 = vmul.f32 %v1340_v58, %v1253_v39  ;;  %v1271_v30 = vmul.f32 %v1265_v62, %v1254_v49 }
 0x5e7   :  { %v1771_v23 = vpack.c.bf16 %v1344_v13, %v1343_v3  ;;  %v1325_v15 = vmul.f32 %v1322_v22, %v1271_v30 }
 0x5e8   :  { %v1268_v18 = vpop.xlane.xlu1 %1267 }
 0x5e9   :  { %v1335_v19 = vadd.f32 %v1331_v61, %v1325_v15  ;;  %v1272_v20 = vmul.f32 %v1268_v18, %v1255_v57  ;;  %1772 = vmatpush3.bf16.msra.mxu0 %v1771_v23 }
 0x5ea   :  { %1773 = vmatprep.subr.bf16.mxu0 %v1892_v55 }
 0x5eb   :  { %v1326_v21 = vmul.f32 %v1322_v22, %v1272_v20  ;;  %v1341_v24 = vadd.f32 %v1338_v51, %v1335_v19 }
 0x5ed   :  { %v1336_v29 = vadd.f32 %v1332_v28, %v1326_v21  ;;  %v1345_v26 = vmul.f32 %v1341_v24, %v1254_v49 }
 0x5ef   :  { %v1342_v25 = vadd.f32 %v1338_v51, %v1336_v29 }
 0x5f1   :  { %v1346_v27 = vmul.f32 %v1342_v25, %v1255_v57 }
 0x5f3   :  { %v1774_v12 = vpack.c.bf16 %v1346_v27, %v1345_v26 }
 0x5f5   :  { %1775 = vmatpush3.bf16.msra.mxu0 %v1774_v12 }
 0x5f8   :  { %1594 = vmatmul.mubr.msk.f32.vlgmr.msra.gmra.mrb[28].mxu0 %vm87_vm0, %v1347_v11 }
 0x6cb   :  { %v1417_v31 = vpop.f32.mrb[28].mxu0 }
 0x6cc   :  { %1422 = vst.msk [vmem:[%s2799_s17] sm:$0xf] %vm1421_vm1, %v1417_v31  ;;  %v1595_v55 = vpop.f32.mrb[29].mxu0 }
 0x6cd   :  { %1427 = vsyncpa [#allocation5], 1 }

</bundles_post_ra>
